<compile_context>
chip_gen: v6e
topology: v6e:2x2x1
jax: 0.10.0
libtpu: 0.0.40
codegen_flags: <defaults>
</compile_context>

<pallas_src>
import functools

import jax
import jax.numpy as jnp
from jax.experimental import pallas as pl
from jax.experimental.pallas import tpu as pltpu


def _conv3x3_tap_kernel(x_ref, w_ref, o_ref, *, tile_h, w_pad):
    """One (batch, row-tile) step of the 3x3 'same' convolution.

    x_ref: (Lpad, Cin)    flattened zero-padded NHWC image of one batch element
    w_ref: (9, Cin, Cout) per-tap weight matrices, tap index = dy*3 + dx
    o_ref: (tile_h * w_pad, Cout) flat conv-output rows for this tile
    """
    m = tile_h * w_pad
    cout = o_ref.shape[-1]

    start = pl.program_id(1) * m
    if m % 8 == 0:
        start = pl.multiple_of(start, 8)        # 8-aligned dynamic window load
    # All 9 taps for this row tile live in rows [start, start + m + 3*w_pad).
    window = x_ref[pl.ds(start, m + 3 * w_pad), :]

    acc = jnp.zeros((m, cout), dtype=jnp.float32)
    for dy in range(3):
        for dx in range(3):
            off = dy * w_pad + dx               # static (compile-time) slice
            acc = acc + jnp.dot(window[off:off + m, :], w_ref[dy * 3 + dx],
                                preferred_element_type=jnp.float32)
    o_ref[...] = acc.astype(o_ref.dtype)


def _pick_tile_h(h, w_pad, cin, cout, vmem_budget_bytes=8 << 20):
    """Largest multiple-of-8 divisor of H whose per-tile footprint fits the
    budget (output block double-buffered + in-kernel window/tap temporaries).
    Falls back to the full image (block == full axis is always legal)."""
    per_row = w_pad * 4 * (2 * cout + 4 * cin)   # bytes per output row, rough
    max_th = max(8, vmem_budget_bytes // max(per_row, 1))
    best = None
    for th in range(8, h + 1, 8):
        if h % th == 0 and th <= max_th:
            best = th
    return best if best is not None else h


def _conv3x3_flat(x_nhwc, w9):
    """3x3 stride-1 pad-1 conv, no bias.  Returns (B, H*(W+2), Cout): the flat
    conv output with 2 junk columns per row (cropped by the callers)."""
    B, H, W, Cin = x_nhwc.shape
    Cout = w9.shape[-1]
    Wp = W + 2
    TH = _pick_tile_h(H, Wp, Cin, Cout)
    m = TH * Wp
    Lp = (H + 3) * Wp                    # 1 top pad row, 1 bottom pad, 1 guard
    xp = jnp.pad(x_nhwc, ((0, 0), (1, 2), (1, 1), (0, 0)))
    x_flat = xp.reshape(B, Lp, Cin)

    kernel = functools.partial(_conv3x3_tap_kernel, tile_h=TH, w_pad=Wp)
    return pl.pallas_call(
        kernel,
        out_shape=jax.ShapeDtypeStruct((B, H * Wp, Cout), x_nhwc.dtype),
        grid_spec=pltpu.PrefetchScalarGridSpec(
            num_scalar_prefetch=0,
            grid=(B, H // TH),
            in_specs=[
                # Full padded image per batch element; resident across row tiles.
                pl.BlockSpec((None, Lp, Cin), lambda b, t: (b, 0, 0)),
                # All 9 tap matrices, fetched once and kept resident.
                pl.BlockSpec((9, Cin, Cout), lambda b, t: (0, 0, 0)),
            ],
            out_specs=pl.BlockSpec((None, m, Cout), lambda b, t: (b, t, 0)),
        ),
        compiler_params=pltpu.CompilerParams(
            # No carried state and disjoint output blocks -> both axes parallel.
            dimension_semantics=("parallel", "parallel"),
            vmem_limit_bytes=48 * 1024 * 1024,
        ),
    )(x_flat, w9)


def _weight_to_taps(weight_oihw):
    """PyTorch Conv2d weight (Cout, Cin, 3, 3) -> (9, Cin, Cout) tap matrices."""
    cout, cin, kh, kw = weight_oihw.shape
    assert kh == 3 and kw == 3
    return jnp.transpose(weight_oihw, (2, 3, 1, 0)).reshape(kh * kw, cin, cout)


@jax.jit
def upsample_nchw(x_nchw, weight_oihw):
    """Exact forward of TPMNet Upsample: NCHW in, NCHW out (PyTorch layout)."""
    B, Cin, H, W = x_nchw.shape
    Cout = weight_oihw.shape[0]
    assert Cout % 4 == 0, "PixelShuffle(2) needs conv output channels % 4 == 0"
    C4 = Cout // 4
    # TODO(synk): in an NHWC end-to-end model use upsample_nhwc and drop this transpose.
    x_nhwc = jnp.transpose(x_nchw, (0, 2, 3, 1))
    y_flat = _conv3x3_flat(x_nhwc, _weight_to_taps(weight_oihw))
    # crop junk columns + PixelShuffle(2) + NHWC->NCHW: one fused XLA pass.
    y = y_flat.reshape(B, H, W + 2, Cout)[:, :, :W, :]
    y = y.reshape(B, H, W, C4, 2, 2).transpose(0, 3, 1, 4, 2, 5)
    return y.reshape(B, C4, 2 * H, 2 * W)


@jax.jit
def upsample_nhwc(x_nhwc, weight_oihw):
    """Same op for NHWC activations (no input/output layout transposes)."""
    B, H, W, _ = x_nhwc.shape
    Cout = weight_oihw.shape[0]
    C4 = Cout // 4
    y_flat = _conv3x3_flat(x_nhwc, _weight_to_taps(weight_oihw))
    y = y_flat.reshape(B, H, W + 2, Cout)[:, :, :W, :]
    y = y.reshape(B, H, W, C4, 2, 2).transpose(0, 1, 4, 2, 5, 3)
    return y.reshape(B, 2 * H, 2 * W, C4)


if __name__ == "__main__":
    key = jax.random.PRNGKey(0)
    kx, kw = jax.random.split(key)
    B, n_feat, H, W = 2, 4, 16, 16
    x = jax.random.normal(kx, (B, n_feat, H, W), dtype=jnp.float32)
    w = 0.1 * jax.random.normal(kw, (2 * n_feat, n_feat, 3, 3), dtype=jnp.float32)

    out = upsample_nchw(x, w)
    out = jax.block_until_ready(out)
    assert out.shape == (B, n_feat // 2, 2 * H, 2 * W), out.shape

    # Pure-JAX reference: conv2d(3x3, pad=1, no bias) followed by PixelShuffle(2).
    conv = jax.lax.conv_general_dilated(
        x, w, window_strides=(1, 1), padding=((1, 1), (1, 1)),
        dimension_numbers=("NCHW", "OIHW", "NCHW"),
        precision=jax.lax.Precision.HIGHEST)
    C4 = (2 * n_feat) // 4
    ref = conv.reshape(B, C4, 2, 2, H, W).transpose(0, 1, 4, 2, 5, 3)
    ref = ref.reshape(B, C4, 2 * H, 2 * W)

    # Tolerance covers MXU multi-pass f32 accumulation differences vs HIGHEST ref.
    assert jnp.allclose(out, ref, atol=2e-2, rtol=2e-2), \
        float(jnp.max(jnp.abs(out - ref)))
    print("KERNEL_OK")
</pallas_src>

<mosaic_0001>
module attributes {stable_mosaic.version = 11 : i64} {
  func.func @_conv3x3_tap_kernel(%arg0: i32, %arg1: i32, %arg2: memref<1x342x4xf32, #tpu.memory_space<vmem>>, %arg3: memref<9x4x8xf32, #tpu.memory_space<vmem>>, %arg4: memref<1x288x8xf32, #tpu.memory_space<vmem>>) attributes {dimension_semantics = [#tpu.dimension_semantics<parallel>, #tpu.dimension_semantics<parallel>], iteration_bounds = array<i64: 2, 1>, scalar_prefetch = 0 : i64, scratch_operands = 0 : i64, tpu.core_type = #tpu.core_type<tc>, window_params = [{transform_indices = @transform_0, window_bounds = array<i64: 1, 342, 4>}, {pipeline_mode = #tpu.pipeline_mode<synchronous>, transform_indices = @transform_1, window_bounds = array<i64: 9, 4, 8>}, {transform_indices = @transform_2, window_bounds = array<i64: 1, 288, 8>}]} {
    %c288_i32 = arith.constant 288 : i32
    %0 = arith.muli %arg1, %c288_i32 : i32
    %1 = tpu.assume_multiple %0, 8 : i32
    %c0 = arith.constant 0 : index
    %2 = arith.index_cast %1 : i32 to index
    %c0_0 = arith.constant 0 : index
    %3 = vector.load %arg2[%c0, %2, %c0_0] : memref<1x342x4xf32, #tpu.memory_space<vmem>>, vector<1x342x4xf32>
    %4 = vector.shape_cast %3 : vector<1x342x4xf32> to vector<342x4xf32>
    %cst = arith.constant 0.000000e+00 : f32
    %5 = vector.broadcast %cst : f32 to vector<288x8xf32>
    %6 = vector.extract_strided_slice %4 {offsets = [0, 0], sizes = [288, 4], strides = [1, 1]} : vector<342x4xf32> to vector<288x4xf32>
    %c0_1 = arith.constant 0 : index
    %c0_2 = arith.constant 0 : index
    %c0_3 = arith.constant 0 : index
    %7 = vector.load %arg3[%c0_1, %c0_2, %c0_3] : memref<9x4x8xf32, #tpu.memory_space<vmem>>, vector<1x4x8xf32>
    %8 = vector.shape_cast %7 : vector<1x4x8xf32> to vector<4x8xf32>
    %cst_4 = arith.constant dense<0.000000e+00> : vector<288x8xf32>
    %9 = tpu.matmul %6, %8, %cst_4 {dimension_numbers = #tpu.dot_dimension_numbers<[1], [0], [0], [1], [0, 0, 1, 1], [], []>} : vector<288x4xf32>, vector<4x8xf32>, vector<288x8xf32> -> vector<288x8xf32>
    %10 = arith.addf %5, %9 : vector<288x8xf32>
    %11 = vector.extract_strided_slice %4 {offsets = [1, 0], sizes = [288, 4], strides = [1, 1]} : vector<342x4xf32> to vector<288x4xf32>
    %c1 = arith.constant 1 : index
    %c0_5 = arith.constant 0 : index
    %c0_6 = arith.constant 0 : index
    %12 = vector.load %arg3[%c1, %c0_5, %c0_6] : memref<9x4x8xf32, #tpu.memory_space<vmem>>, vector<1x4x8xf32>
    %13 = vector.shape_cast %12 : vector<1x4x8xf32> to vector<4x8xf32>
    %cst_7 = arith.constant dense<0.000000e+00> : vector<288x8xf32>
    %14 = tpu.matmul %11, %13, %cst_7 {dimension_numbers = #tpu.dot_dimension_numbers<[1], [0], [0], [1], [0, 0, 1, 1], [], []>} : vector<288x4xf32>, vector<4x8xf32>, vector<288x8xf32> -> vector<288x8xf32>
    %15 = arith.addf %10, %14 : vector<288x8xf32>
    %16 = vector.extract_strided_slice %4 {offsets = [2, 0], sizes = [288, 4], strides = [1, 1]} : vector<342x4xf32> to vector<288x4xf32>
    %c2 = arith.constant 2 : index
    %c0_8 = arith.constant 0 : index
    %c0_9 = arith.constant 0 : index
    %17 = vector.load %arg3[%c2, %c0_8, %c0_9] : memref<9x4x8xf32, #tpu.memory_space<vmem>>, vector<1x4x8xf32>
    %18 = vector.shape_cast %17 : vector<1x4x8xf32> to vector<4x8xf32>
    %cst_10 = arith.constant dense<0.000000e+00> : vector<288x8xf32>
    %19 = tpu.matmul %16, %18, %cst_10 {dimension_numbers = #tpu.dot_dimension_numbers<[1], [0], [0], [1], [0, 0, 1, 1], [], []>} : vector<288x4xf32>, vector<4x8xf32>, vector<288x8xf32> -> vector<288x8xf32>
    %20 = arith.addf %15, %19 : vector<288x8xf32>
    %21 = vector.extract_strided_slice %4 {offsets = [18, 0], sizes = [288, 4], strides = [1, 1]} : vector<342x4xf32> to vector<288x4xf32>
    %c3 = arith.constant 3 : index
    %c0_11 = arith.constant 0 : index
    %c0_12 = arith.constant 0 : index
    %22 = vector.load %arg3[%c3, %c0_11, %c0_12] : memref<9x4x8xf32, #tpu.memory_space<vmem>>, vector<1x4x8xf32>
    %23 = vector.shape_cast %22 : vector<1x4x8xf32> to vector<4x8xf32>
    %cst_13 = arith.constant dense<0.000000e+00> : vector<288x8xf32>
    %24 = tpu.matmul %21, %23, %cst_13 {dimension_numbers = #tpu.dot_dimension_numbers<[1], [0], [0], [1], [0, 0, 1, 1], [], []>} : vector<288x4xf32>, vector<4x8xf32>, vector<288x8xf32> -> vector<288x8xf32>
    %25 = arith.addf %20, %24 : vector<288x8xf32>
    %26 = vector.extract_strided_slice %4 {offsets = [19, 0], sizes = [288, 4], strides = [1, 1]} : vector<342x4xf32> to vector<288x4xf32>
    %c4 = arith.constant 4 : index
    %c0_14 = arith.constant 0 : index
    %c0_15 = arith.constant 0 : index
    %27 = vector.load %arg3[%c4, %c0_14, %c0_15] : memref<9x4x8xf32, #tpu.memory_space<vmem>>, vector<1x4x8xf32>
    %28 = vector.shape_cast %27 : vector<1x4x8xf32> to vector<4x8xf32>
    %cst_16 = arith.constant dense<0.000000e+00> : vector<288x8xf32>
    %29 = tpu.matmul %26, %28, %cst_16 {dimension_numbers = #tpu.dot_dimension_numbers<[1], [0], [0], [1], [0, 0, 1, 1], [], []>} : vector<288x4xf32>, vector<4x8xf32>, vector<288x8xf32> -> vector<288x8xf32>
    %30 = arith.addf %25, %29 : vector<288x8xf32>
    %31 = vector.extract_strided_slice %4 {offsets = [20, 0], sizes = [288, 4], strides = [1, 1]} : vector<342x4xf32> to vector<288x4xf32>
    %c5 = arith.constant 5 : index
    %c0_17 = arith.constant 0 : index
    %c0_18 = arith.constant 0 : index
    %32 = vector.load %arg3[%c5, %c0_17, %c0_18] : memref<9x4x8xf32, #tpu.memory_space<vmem>>, vector<1x4x8xf32>
    %33 = vector.shape_cast %32 : vector<1x4x8xf32> to vector<4x8xf32>
    %cst_19 = arith.constant dense<0.000000e+00> : vector<288x8xf32>
    %34 = tpu.matmul %31, %33, %cst_19 {dimension_numbers = #tpu.dot_dimension_numbers<[1], [0], [0], [1], [0, 0, 1, 1], [], []>} : vector<288x4xf32>, vector<4x8xf32>, vector<288x8xf32> -> vector<288x8xf32>
    %35 = arith.addf %30, %34 : vector<288x8xf32>
    %36 = vector.extract_strided_slice %4 {offsets = [36, 0], sizes = [288, 4], strides = [1, 1]} : vector<342x4xf32> to vector<288x4xf32>
    %c6 = arith.constant 6 : index
    %c0_20 = arith.constant 0 : index
    %c0_21 = arith.constant 0 : index
    %37 = vector.load %arg3[%c6, %c0_20, %c0_21] : memref<9x4x8xf32, #tpu.memory_space<vmem>>, vector<1x4x8xf32>
    %38 = vector.shape_cast %37 : vector<1x4x8xf32> to vector<4x8xf32>
    %cst_22 = arith.constant dense<0.000000e+00> : vector<288x8xf32>
    %39 = tpu.matmul %36, %38, %cst_22 {dimension_numbers = #tpu.dot_dimension_numbers<[1], [0], [0], [1], [0, 0, 1, 1], [], []>} : vector<288x4xf32>, vector<4x8xf32>, vector<288x8xf32> -> vector<288x8xf32>
    %40 = arith.addf %35, %39 : vector<288x8xf32>
    %41 = vector.extract_strided_slice %4 {offsets = [37, 0], sizes = [288, 4], strides = [1, 1]} : vector<342x4xf32> to vector<288x4xf32>
    %c7 = arith.constant 7 : index
    %c0_23 = arith.constant 0 : index
    %c0_24 = arith.constant 0 : index
    %42 = vector.load %arg3[%c7, %c0_23, %c0_24] : memref<9x4x8xf32, #tpu.memory_space<vmem>>, vector<1x4x8xf32>
    %43 = vector.shape_cast %42 : vector<1x4x8xf32> to vector<4x8xf32>
    %cst_25 = arith.constant dense<0.000000e+00> : vector<288x8xf32>
    %44 = tpu.matmul %41, %43, %cst_25 {dimension_numbers = #tpu.dot_dimension_numbers<[1], [0], [0], [1], [0, 0, 1, 1], [], []>} : vector<288x4xf32>, vector<4x8xf32>, vector<288x8xf32> -> vector<288x8xf32>
    %45 = arith.addf %40, %44 : vector<288x8xf32>
    %46 = vector.extract_strided_slice %4 {offsets = [38, 0], sizes = [288, 4], strides = [1, 1]} : vector<342x4xf32> to vector<288x4xf32>
    %c8 = arith.constant 8 : index
    %c0_26 = arith.constant 0 : index
    %c0_27 = arith.constant 0 : index
    %47 = vector.load %arg3[%c8, %c0_26, %c0_27] : memref<9x4x8xf32, #tpu.memory_space<vmem>>, vector<1x4x8xf32>
    %48 = vector.shape_cast %47 : vector<1x4x8xf32> to vector<4x8xf32>
    %cst_28 = arith.constant dense<0.000000e+00> : vector<288x8xf32>
    %49 = tpu.matmul %46, %48, %cst_28 {dimension_numbers = #tpu.dot_dimension_numbers<[1], [0], [0], [1], [0, 0, 1, 1], [], []>} : vector<288x4xf32>, vector<4x8xf32>, vector<288x8xf32> -> vector<288x8xf32>
    %50 = arith.addf %45, %49 : vector<288x8xf32>
    %c0_29 = arith.constant 0 : index
    %c0_30 = arith.constant 0 : index
    %c0_31 = arith.constant 0 : index
    %51 = vector.load %arg4[%c0_29, %c0_30, %c0_31] : memref<1x288x8xf32, #tpu.memory_space<vmem>>, vector<1x288x8xf32>
    %52 = vector.shape_cast %51 : vector<1x288x8xf32> to vector<288x8xf32>
    %53 = vector.shape_cast %50 : vector<288x8xf32> to vector<1x288x8xf32>
    tpu.vector_store %arg4[%c0_29, %c0_30, %c0_31], %53 {strides = array<i32>} : memref<1x288x8xf32, #tpu.memory_space<vmem>>, vector<1x288x8xf32>,
    return
  }
  func.func @transform_0(%arg0: i32, %arg1: i32) -> (i32, i32, i32) {
    %c0_i32 = arith.constant 0 : i32
    %c0_i32_0 = arith.constant 0 : i32
    %c0_i32_1 = arith.constant 0 : i32
    return %arg0, %c0_i32, %c0_i32_0 : i32, i32, i32
  }
  func.func @transform_1(%arg0: i32, %arg1: i32) -> (i32, i32, i32) {
    %c0_i32 = arith.constant 0 : i32
    %c0_i32_0 = arith.constant 0 : i32
    %c0_i32_1 = arith.constant 0 : i32
    %c0_i32_2 = arith.constant 0 : i32
    return %c0_i32, %c0_i32_0, %c0_i32_1 : i32, i32, i32
  }
  func.func @transform_2(%arg0: i32, %arg1: i32) -> (i32, i32, i32) {
    %c0_i32 = arith.constant 0 : i32
    %c0_i32_0 = arith.constant 0 : i32
    return %arg0, %arg1, %c0_i32 : i32, i32, i32
  }
}

</mosaic_0001>

<bundles_post_ra>
// kernel: upsample_nchw.1
= control target key start
LH: loop header
LB: loop body
LE: loop exit
PB: predicated region body
PF: predicated region fallthrough
CT: control target
= control target key end

     0   :  { %s5126_s9 = smov 0   ;;  %s5128_s10 = smov 0   ;;  %s6841_s0 = inlined_call_operand.vmem [shape: f32[2,342,4], index: 0, kind: input, shape index: {}]   ;;  %s6842_s1 = inlined_call_operand.vmem [shape: f32[9,4,8], index: 1, kind: input, shape index: {}]   ;;  %s6843_s2 = inlined_call_operand.vmem [shape: f32[2,288,8], index: 2, kind: output, shape index: {}]  }
   0x1   :  { %s5130_s11 = smov 0  }
   0x2 LB: > { %s24_s12 = sadd.s32 1, %s5105_s10  ;;  %p3841_p0 = scmp.ge.s32.totalorder %s5109_s11, 1  ;;  %s5109_s11 = sphi %s5130_s11, %s12_s11   ;;  %s5105_s10 = sphi %s5128_s10, %s6926_s10   ;;  %s5101_s9 = sphi %s5126_s9, %s6925_s9  }
   0x3   : > { %p26_p1 = scmp.ge.s32.totalorder %s24_s12, 2  ;;  %p126_p2 = scmp.lt.s32.totalorder %s5109_s11, 3 }
   0x5   : > { %s6928_s12 = smov (%p26_p1, %s24_s12), 0  ;;  %p127_p3 = pnand %p3841_p0, %p126_p2 }
   0x7   : > { %130 = sbr.rel (%p127_p3) target bundleno = 544 (0x220), region = 28 }
   0xc   : > { %v3844_v0 = vld [vmem:[%s6842_s1 + $0x4] sm:$0xf]  ;;  %vm397_vm0 = vcmask 1043456   ;;  %p152_p4 = scmp.lt.s32.totalorder %s5101_s9, 1  ;;  %v210_v1 = vld [vmem:[%s6842_s1] sm:$0xf] }
   0xd   : > { %5024 = vmatprep.subr.msk.mxu1 %vm397_vm0, %v3844_v0  ;;  %4520 = vmatprep.subr.msk.mxu0 %vm397_vm0, %v3844_v0  ;;  %v3919_v2 = vld [vmem:[%s6842_s1 + $0x8] sm:$0xf]  ;;  %vm250_vm1 = vcmask 1046528   ;;  %vm324_vm2 = vcmask 31744   ;;  %v5240_v36 = vld [vmem:[%s6842_s1 + $0xc] sm:$0xf] }
   0xe   : > { %5025 = vmatpush3.msk.msra.mxu1 %vm397_vm0, %v3844_v0  ;;  %4521 = vmatpush3.msk.msra.mxu0 %vm397_vm0, %v3844_v0  ;;  %s6930_s9 = smov (!%p152_p4, %s5101_s9), 1  ;;  %v5250_v40 = vld [vmem:[%s6842_s1 + $0x10] sm:$0xf]  ;;  %vm968_vm3 = vcmask 1045504   ;;  %vm1696_vm4 = vcmask 1044480   ;;  %vm3287_vm5 = vcmask 1041408  }
   0xf   : > { %4576 = vmatprep.subr.msk.mxu1 %vm397_vm0, %v210_v1  ;;  %4632 = vmatprep.subr.msk.mxu0 %vm397_vm0, %v3919_v2  ;;  %s5026_s19 = smul.u32 344, %s6930_s9  ;;  %vm2855_vm6 = vcmask 1042432   ;;  %vm3717_vm7 = vcmask 64512  }
  0x10   : > { %s5027_s7 = smul.u32 288, %s6930_s9 }
  0x11   : > { %s5165_s22 = scalar_lea.vmem %s6841_s0, %s5026_s19 }
  0x12   : > { %v5168_v3 = vld [vmem:[%s5165_s22] sm:$0xff]  ;;  %v5171_v4 = vld [vmem:[%s5165_s22 + $0x8] sm:$0xff]  ;;  %v5174_v5 = vld [vmem:[%s5165_s22 + $0x90] sm:$0xff]  ;;  %s6723_s14 = scalar_lea.vmem %s6843_s2, %s5027_s7 }
  0x13   : > { %v251_v6 = vrot.slane %v5168_v3, 1  ;;  %v252_v7 = vrot.slane %v5171_v4, 1  ;;  %v5179_v8 = vld [vmem:[%s5165_s22 + $0x98] sm:$0xff]  ;;  %v286_v9 = vrot.slane %v5174_v5, 1  ;;  %v5183_v10 = vld [vmem:[%s5165_s22 + $0x10] sm:$0xff]  ;;  %v5186_v11 = vld [vmem:[%s5165_s22 + $0xa0] sm:$0xff] }
  0x14   : > { %v288_v12 = vrot.slane %v5179_v8, 1  ;;  %v254_v13 = vrot.slane %v5183_v10, 1  ;;  %v290_v14 = vrot.slane %v5186_v11, 1  ;;  %v5192_v15 = vld [vmem:[%s5165_s22 + $0x18] sm:$0xff]  ;;  %v5195_v16 = vld [vmem:[%s5165_s22 + $0xa8] sm:$0xff]  ;;  %v5198_v17 = vld [vmem:[%s5165_s22 + $0x20] sm:$0xff] }
  0x15   : > { %6869 = vst [vmem:[#allocation2_spill] sm:$0xff] %v5198_v17  ;;  %v253_v18 = vsel %vm250_vm1, %v251_v6, %v252_v7  ;;  %v256_v19 = vrot.slane %v5192_v15, 1  ;;  %v292_v20 = vrot.slane %v5195_v16, 1  ;;  %v258_v21 = vrot.slane %v5198_v17, 1  ;;  %v5205_v22 = vld [vmem:[%s5165_s22 + $0xb0] sm:$0xff]  ;;  %v5208_v23 = vld [vmem:[%s5165_s22 + $0x28] sm:$0xff] }
  0x16   : > { %6870 = vst [vmem:[#allocation3_spill] sm:$0xff] %v5208_v23  ;;  %v5211_v24 = vld [vmem:[%s5165_s22 + $0xb8] sm:$0xff]  ;;  %4522 = vmatprep.mubr.msk.f32.mxu0 %vm324_vm2, %v253_v18  ;;  %v289_v25 = vsel %vm250_vm1, %v286_v9, %v288_v12  ;;  %v255_v26 = vsel %vm250_vm1, %v252_v7, %v254_v13  ;;  %v291_v27 = vsel %vm250_vm1, %v288_v12, %v290_v14  ;;  %v294_v28 = vrot.slane %v5205_v22, 1  ;;  %v5221_v29 = vld [vmem:[%s5165_s22 + $0x30] sm:$0xff]  ;;  %v5224_v30 = vld [vmem:[%s5165_s22 + $0xc0] sm:$0xff] }
  0x17   : > { %v5227_v31 = vld [vmem:[%s5165_s22 + $0x38] sm:$0xff]  ;;  %4549 = vmatprep.mubr.msk.f32.mxu1 %vm324_vm2, %v289_v25  ;;  %4523 = vmatmul.mubr.msk.f32.vlgmr.msra.gmra.mxu0 %vm324_vm2, %v255_v26  ;;  %v257_v32 = vsel %vm250_vm1, %v254_v13, %v256_v19  ;;  %v293_v33 = vsel %vm250_vm1, %v290_v14, %v292_v20  ;;  %v260_v34 = vrot.slane %v5208_v23, 1  ;;  %v5235_v35 = vld [vmem:[%s5165_s22 + $0xc8] sm:$0xff]  ;;  %v259_v37 = vsel %vm250_vm1, %v256_v19, %v258_v21  ;;  %v5259_v45 = vld [vmem:[%s5165_s22 + $0x40] sm:$0xff] }
  0x18   : > { %4550 = vmatmul.mubr.msk.f32.vlgmr.msra.gmra.mxu1 %vm324_vm2, %v291_v27  ;;  %4633 = vmatpush3.msk.msra.mxu0 %vm397_vm0, %v3919_v2  ;;  %v296_v38 = vrot.slane %v5211_v24, 1  ;;  %v262_v39 = vrot.slane %v5221_v29, 1  ;;  %v295_v41 = vsel %vm250_vm1, %v292_v20, %v294_v28  ;;  %v298_v43 = vrot.slane %v5224_v30, 1  ;;  %v5265_v48 = vld [vmem:[%s5165_s22 + $0xd0] sm:$0xff]  ;;  %v5268_v49 = vld [vmem:[%s5165_s22 + $0x48] sm:$0xff]  ;;  %v5274_v50 = vld [vmem:[%s5165_s22 + $0xd8] sm:$0xff] }
  0x19   : > { %4577 = vmatpush3.msk.msra.mxu1 %vm397_vm0, %v210_v1  ;;  %4525 = vmatprep.mubr.msk.f32.mxu0 %vm324_vm2, %v257_v32  ;;  %v261_v42 = vsel %vm250_vm1, %v258_v21, %v260_v34  ;;  %v264_v44 = vrot.slane %v5227_v31, 1  ;;  %v300_v47 = vrot.slane %v5235_v35, 1  ;;  %v266_v52 = vrot.slane %v5259_v45, 1  ;;  %v5288_v57 = vld [vmem:[%s5165_s22 + $0x50] sm:$0xff]  ;;  %v5293_v60 = vld [vmem:[%s5165_s22 + $0xe0] sm:$0xff]  ;;  %v5296_v61 = vld [vmem:[%s5165_s22 + $0x58] sm:$0xff] }
  0x1a   : > { %4552 = vmatprep.mubr.msk.f32.mxu1 %vm324_vm2, %v293_v33  ;;  %v297_v46 = vsel %vm250_vm1, %v294_v28, %v296_v38  ;;  %4688 = vmatprep.subr.msk.mxu1 %vm397_vm0, %v5240_v36  ;;  %v263_v51 = vsel %vm250_vm1, %v260_v34, %v262_v39  ;;  %v299_v53 = vsel %vm250_vm1, %v296_v38, %v298_v43  ;;  %v302_v55 = vrot.slane %v5265_v48, 1  ;;  %v5300_v62 = vld [vmem:[%s5165_s22 + $0xe8] sm:$0xff]  ;;  %v5312_v12 = vld [vmem:[%s5165_s22 + $0x60] sm:$0xff]  ;;  %v5317_v18 = vld [vmem:[%s5165_s22 + $0xf0] sm:$0xff] }
  0x1b   : > { %4526 = vmatmul.mubr.msk.f32.gmra.mxu0 %vm324_vm2, %v259_v37  ;;  %4744 = vmatprep.subr.msk.mxu0 %vm397_vm0, %v5250_v40  ;;  %v265_v54 = vsel %vm250_vm1, %v262_v39, %v264_v44  ;;  %v268_v56 = vrot.slane %v5268_v49, 1  ;;  %v301_v58 = vsel %vm250_vm1, %v298_v43, %v300_v47  ;;  %v304_v59 = vrot.slane %v5274_v50, 1  ;;  %v5320_v19 = vld [vmem:[%s5165_s22 + $0x68] sm:$0xff]  ;;  %v5324_v20 = vld [vmem:[%s5165_s22 + $0xf8] sm:$0xff]  ;;  %v5336_v33 = vld [vmem:[%s5165_s22 + $0x70] sm:$0xff] }
  0x1c   : > { %4553 = vmatmul.mubr.msk.f32.gmra.mxu1 %vm324_vm2, %v295_v41  ;;  %4528 = vmatprep.mubr.msk.f32.mxu0 %vm324_vm2, %v261_v42  ;;  %v267_v63 = vsel %vm250_vm1, %v264_v44, %v266_v52  ;;  %v270_v0 = vrot.slane %v5288_v57, 1  ;;  %v303_v1 = vsel %vm250_vm1, %v300_v47, %v302_v55  ;;  %v306_v6 = vrot.slane %v5293_v60, 1  ;;  %v5341_v38 = vld [vmem:[%s5165_s22 + $0x100] sm:$0xff]  ;;  %v5344_v39 = vld [vmem:[%s5165_s22 + $0x78] sm:$0xff]  ;;  %v5348_v41 = vld [vmem:[%s5165_s22 + $0x108] sm:$0xff] }
  0x1d   : > { %4555 = vmatprep.mubr.msk.f32.mxu1 %vm324_vm2, %v297_v46  ;;  %v269_v2 = vsel %vm250_vm1, %v266_v52, %v268_v56  ;;  %v272_v7 = vrot.slane %v5296_v61, 1  ;;  %v305_v13 = vsel %vm250_vm1, %v302_v55, %v304_v59  ;;  %v308_v14 = vrot.slane %v5300_v62, 1  ;;  %v5360_v52 = vld [vmem:[%s5165_s22 + $0x80] sm:$0xff] }
  0x1e   : > { %v271_v21 = vsel %vm250_vm1, %v268_v56, %v270_v0  ;;  %v274_v25 = vrot.slane %v5312_v12, 1  ;;  %v307_v26 = vsel %vm250_vm1, %v304_v59, %v306_v6  ;;  %v310_v28 = vrot.slane %v5317_v18, 1  ;;  %v5368_v56 = vld [vmem:[%s5165_s22 + $0x88] sm:$0xff] }
  0x1f   : > { %4529 = vmatmul.mubr.msk.f32.gmra.mxu0 %vm324_vm2, %v263_v51  ;;  %v273_v27 = vsel %vm250_vm1, %v270_v0, %v272_v7  ;;  %v276_v32 = vrot.slane %v5320_v19, 1  ;;  %v309_v34 = vsel %vm250_vm1, %v306_v6, %v308_v14  ;;  %v312_v37 = vrot.slane %v5324_v20, 1 }
  0x20   : > { %4556 = vmatmul.mubr.msk.f32.gmra.mxu1 %vm324_vm2, %v299_v53  ;;  %4531 = vmatprep.mubr.msk.f32.mxu0 %vm324_vm2, %v265_v54  ;;  %v275_v42 = vsel %vm250_vm1, %v272_v7, %v274_v25  ;;  %v278_v43 = vrot.slane %v5336_v33, 1  ;;  %v311_v44 = vsel %vm250_vm1, %v308_v14, %v310_v28  ;;  %v314_v47 = vrot.slane %v5341_v38, 1  ;;  %v5363_v53 = vld [vmem:[%s5165_s22 + $0x110] sm:$0xff]  ;;  %v5386_v14 = vld [vmem:[%s5165_s22 + $0x120] sm:$0xff] }
  0x21   : > { %4558 = vmatprep.mubr.msk.f32.mxu1 %vm324_vm2, %v301_v58  ;;  %v277_v46 = vsel %vm250_vm1, %v274_v25, %v276_v32  ;;  %v280_v51 = vrot.slane %v5344_v39, 1  ;;  %v313_v54 = vsel %vm250_vm1, %v310_v28, %v312_v37  ;;  %v316_v55 = vrot.slane %v5348_v41, 1  ;;  %v5372_v58 = vld [vmem:[%s5165_s22 + $0x118] sm:$0xff] }
  0x22   : > { %v279_v59 = vsel %vm250_vm1, %v276_v32, %v278_v43  ;;  %v318_v0 = vrot.slane %v5363_v53, 1  ;;  %v284_v6 = vrot.slane %v5368_v56, 1  ;;  %v969_v28 = vrot.slane %v5168_v3, 2 }
  0x23   : > { %4532 = vmatmul.mubr.msk.f32.gmra.mxu0 %vm324_vm2, %v267_v63  ;;  %v282_v63 = vrot.slane %v5360_v52, 1  ;;  %v317_v7 = vsel %vm250_vm1, %v314_v47, %v316_v55  ;;  %v970_v32 = vrot.slane %v5171_v4, 2 }
  0x24   : > { %4559 = vmatmul.mubr.msk.f32.gmra.mxu1 %vm324_vm2, %v303_v1  ;;  %4534 = vmatprep.mubr.msk.f32.mxu0 %vm324_vm2, %v269_v2  ;;  %v315_v1 = vsel %vm250_vm1, %v312_v37, %v314_v47  ;;  %v281_v2 = vsel %vm250_vm1, %v278_v43, %v280_v51  ;;  %v319_v25 = vsel %vm250_vm1, %v316_v55, %v318_v0  ;;  %v1697_v47 = vrot.slane %v5183_v10, 3 }
  0x25   : > { %4561 = vmatprep.mubr.msk.f32.mxu1 %vm324_vm2, %v305_v13  ;;  %v320_v13 = vrot.slane %v5372_v58, 1  ;;  %v287_v37 = vsel %vm250_vm1, %v284_v6, %v286_v9  ;;  %v978_v55 = vrot.slane %v5208_v23, 2 }
  0x27   : > { %4535 = vmatmul.mubr.msk.f32.gmra.mxu0 %vm324_vm2, %v271_v21  ;;  %v283_v21 = vsel %vm250_vm1, %v280_v51, %v282_v63  ;;  %v6846_v51 = vrot.slane %v5192_v15, 3 }
  0x28   : > { %4562 = vmatmul.mubr.msk.f32.gmra.mxu1 %vm324_vm2, %v307_v26  ;;  %4537 = vmatprep.mubr.msk.f32.mxu0 %vm324_vm2, %v273_v27  ;;  %v285_v26 = vsel %vm250_vm1, %v282_v63, %v284_v6  ;;  %v322_v27 = vrot.slane %v5386_v14, 1  ;;  %v984_v6 = vrot.slane %v5259_v45, 2 }
  0x29   : > { %4564 = vmatprep.mubr.msk.f32.mxu1 %vm324_vm2, %v309_v34  ;;  %v321_v34 = vsel %vm250_vm1, %v318_v0, %v320_v13  ;;  %v5432_v0 = vld [vmem:[%s6842_s1 + $0x14] sm:$0xf] }
  0x2a   : > { %v323_v43 = vsel %vm250_vm1, %v320_v13, %v322_v27  ;;  %v986_v13 = vrot.slane %v5268_v49, 2  ;;  %v990_v27 = vrot.slane %v5296_v61, 2 }
  0x2b   : > { %4538 = vmatmul.mubr.msk.f32.gmra.mxu0 %vm324_vm2, %v275_v42  ;;  %v972_v42 = vrot.slane %v5183_v10, 2 }
  0x2c   : > { %4565 = vmatmul.mubr.msk.f32.gmra.mxu1 %vm324_vm2, %v311_v44  ;;  %4540 = vmatprep.mubr.msk.f32.mxu0 %vm324_vm2, %v277_v46  ;;  %v971_v44 = vsel %vm968_vm3, %v969_v28, %v970_v32  ;;  %v974_v46 = vrot.slane %v5192_v15, 2  ;;  %v5494_v28 = vld [vmem:[%s5165_s22 + $0x128] sm:$0xff] }
  0x2d   : > { %4567 = vmatprep.mubr.msk.f32.mxu1 %vm324_vm2, %v313_v54  ;;  %v973_v9 = vsel %vm968_vm3, %v970_v32, %v972_v42  ;;  %v976_v54 = vrot.slane %v5198_v17, 2  ;;  %6871 = vst [vmem:[#allocation4_spill] sm:$0xff] %v5494_v28 }
  0x2e   : > { %v5427_v63 = vsel %vm968_vm3, %v972_v42, %v974_v46  ;;  %v6845_v42 = vrot.slane %v5494_v28, 2  ;;  %v1020_v28 = vrot.slane %v5265_v48, 2 }
  0x2f   : > { %4541 = vmatmul.mubr.msk.f32.gmra.mxu0 %vm324_vm2, %v279_v59  ;;  %v5423_v59 = vsel %vm1696_vm4, %v1697_v47, %v6846_v51  ;;  %v2128_v47 = vrot.slane %v5183_v10, 4  ;;  %v1012_v51 = vrot.slane %v5205_v22, 2 }
  0x30   : > { %4568 = vmatmul.mubr.msk.f32.gmra.mxu1 %vm324_vm2, %v315_v1  ;;  %4543 = vmatprep.mubr.msk.f32.mxu0 %vm324_vm2, %v281_v2  ;;  %v980_v1 = vrot.slane %v5221_v29, 2  ;;  %v5445_v2 = vld [vmem:[%s6842_s1 + $0x18] sm:$0xf] }
  0x31   : > { %4570 = vmatprep.mubr.msk.f32.mxu1 %vm324_vm2, %v317_v7 }
  0x33   : > { %4544 = vmatmul.mubr.msk.f32.gmra.mxu0 %vm324_vm2, %v283_v21 }
  0x34   : > { %4571 = vmatmul.mubr.msk.f32.gmra.mxu1 %vm324_vm2, %v319_v25  ;;  %4546 = vmatprep.mubr.msk.f32.mxu0 %vm324_vm2, %v285_v26  ;;  %v988_v25 = vrot.slane %v5288_v57, 2  ;;  %v5490_v26 = vsel %vm968_vm3, %v984_v6, %v986_v13 }
  0x35   : > { %4573 = vmatprep.mubr.msk.f32.mxu1 %vm324_vm2, %v321_v34  ;;  %v992_v34 = vrot.slane %v5312_v12, 2 }
  0x36   : > { %v5503_v32 = vsel %vm968_vm3, %v986_v13, %v988_v25  ;;  %v1000_v13 = vrot.slane %v5360_v52, 2 }
  0x37   : > { %4547 = vmatmul.mubr.msk.f32.gmra.mxu0 %vm324_vm2, %v287_v37  ;;  %v6847_v37 = vrot.slane %v5386_v14, 2 }
  0x38   : > { %4574 = vmatmul.mubr.msk.f32.gmra.mxu1 %vm324_vm2, %v323_v43  ;;  %4634 = vmatprep.mubr.msk.f32.mxu0 %vm324_vm2, %v971_v44  ;;  %v5511_v43 = vsel %vm968_vm3, %v988_v25, %v990_v27  ;;  %v994_v44 = vrot.slane %v5320_v19, 2 }
  0x39   : > { %4578 = vmatprep.mubr.msk.f32.mxu1 %vm324_vm2, %v5168_v3  ;;  %v5439_v3 = vsel %vm968_vm3, %v974_v46, %v976_v54  ;;  %v5519_v46 = vsel %vm968_vm3, %v6847_v37, %v6845_v42  ;;  %v1010_v42 = vrot.slane %v5195_v16, 2  ;;  %v1014_v37 = vrot.slane %v5211_v24, 2 }
  0x3a   : > { %6872 = vst [vmem:[#allocation5_spill] sm:$0xff] %v5519_v46  ;;  %v1018_v46 = vrot.slane %v5235_v35, 2 }
  0x3b   : > { %4635 = vmatmul.mubr.msk.f32.vlgmr.msra.gmra.mxu0 %vm324_vm2, %v973_v9  ;;  %v6844_v9 = vrot.slane %v5192_v15, 4 }
  0x3c   : > { %4579 = vmatmul.mubr.msk.f32.vlgmr.msra.gmra.mxu1 %vm324_vm2, %v5171_v4  ;;  %4745 = vmatpush3.msk.msra.mxu0 %vm397_vm0, %v5250_v40  ;;  %v5452_v4 = vsel %vm968_vm3, %v976_v54, %v978_v55  ;;  %v982_v40 = vrot.slane %v5227_v31, 2  ;;  %v5530_v54 = vsel %vm968_vm3, %v990_v27, %v992_v34  ;;  %v1002_v27 = vrot.slane %v5368_v56, 2 }
  0x3d   : > { %4689 = vmatpush3.msk.msra.mxu1 %vm397_vm0, %v5240_v36  ;;  %4581 = vmatprep.mubr.msk.f32.mxu1 %vm324_vm2, %v5183_v10  ;;  %v5468_v36 = vsel %vm968_vm3, %v978_v55, %v980_v1  ;;  %v996_v55 = vrot.slane %v5336_v33, 2  ;;  %v5536_v10 = vsel %vm397_vm0, %v2128_v47, %v6844_v9  ;;  %v1008_v9 = vrot.slane %v5186_v11, 2 }
  0x3e   : > { %4637 = vmatprep.mubr.msk.f32.mxu0 %vm324_vm2, %v5427_v63  ;;  %4800 = vmatprep.subr.msk.mxu1 %vm397_vm0, %v5432_v0  ;;  %v5474_v7 = vsel %vm968_vm3, %v980_v1, %v982_v40  ;;  %v5484_v21 = vsel %vm968_vm3, %v982_v40, %v984_v6  ;;  %6873 = vst [vmem:[#allocation6_spill] sm:$0xff] %v5536_v10  ;;  %v998_v40 = vrot.slane %v5344_v39, 2  ;;  %v1016_v10 = vrot.slane %v5224_v30, 2 }
  0x3f   : > { %4638 = vmatmul.mubr.msk.f32.gmra.mxu0 %vm324_vm2, %v5439_v3  ;;  %4856 = vmatprep.subr.msk.mxu0 %vm397_vm0, %v5445_v2  ;;  %v5541_v1 = vsel %vm968_vm3, %v992_v34, %v994_v44  ;;  %v5551_v6 = vsel %vm968_vm3, %v994_v44, %v996_v55  ;;  %v1004_v44 = vrot.slane %v5174_v5, 2  ;;  %v5573_v47 = vsel %vm968_vm3, %v1000_v13, %v1002_v27 }
  0x40   : > { %4582 = vmatmul.mubr.msk.f32.gmra.mxu1 %vm324_vm2, %v5192_v15  ;;  %4640 = vmatprep.mubr.msk.f32.mxu0 %vm324_vm2, %v5452_v4  ;;  %v5557_v25 = vsel %vm968_vm3, %v996_v55, %v998_v40  ;;  %v5567_v34 = vsel %vm968_vm3, %v998_v40, %v1000_v13  ;;  %v1006_v55 = vrot.slane %v5179_v8, 2 }
  0x41   : > { %4584 = vmatprep.mubr.msk.f32.mxu1 %vm324_vm2, %v5198_v17  ;;  %v5583_v40 = vsel %vm968_vm3, %v1002_v27, %v1004_v44 }
  0x42   : > { %v5589_v13 = vsel %vm968_vm3, %v1004_v44, %v1006_v55  ;;  %v5599_v27 = vsel %vm968_vm3, %v1006_v55, %v1008_v9  ;;  %v5605_v44 = vsel %vm968_vm3, %v1008_v9, %v1010_v42  ;;  %v5615_v55 = vsel %vm968_vm3, %v1010_v42, %v1012_v51 }
  0x43   : > { %4641 = vmatmul.mubr.msk.f32.gmra.mxu0 %vm324_vm2, %v5468_v36  ;;  %6874 = vst [vmem:[#allocation7_spill] sm:$0xff] %v5605_v44  ;;  %6875 = vst [vmem:[#allocation8_spill] sm:$0xff] %v5615_v55  ;;  %v5621_v9 = vsel %vm968_vm3, %v1012_v51, %v1014_v37  ;;  %v5631_v42 = vsel %vm968_vm3, %v1014_v37, %v1016_v10  ;;  %v5637_v51 = vsel %vm968_vm3, %v1016_v10, %v1018_v46 }
  0x44   : > { %4585 = vmatmul.mubr.msk.f32.gmra.mxu1 %vm324_vm2, %v5208_v23  ;;  %4643 = vmatprep.mubr.msk.f32.mxu0 %vm324_vm2, %v5474_v7  ;;  %6876 = vst [vmem:[#allocation9_spill] sm:$0xff] %v5621_v9  ;;  %6877 = vst [vmem:[#allocation10_spill] sm:$0xff] %v5631_v42  ;;  %v5647_v37 = vsel %vm968_vm3, %v1018_v46, %v1020_v28 }
  0x45   : > { %4587 = vmatprep.mubr.msk.f32.mxu1 %vm324_vm2, %v5221_v29  ;;  %6878 = vst [vmem:[#allocation11_spill] sm:$0xff] %v5637_v51  ;;  %6879 = vst [vmem:[#allocation12_spill] sm:$0xff] %v5647_v37 }
  0x47   : > { %4644 = vmatmul.mubr.msk.f32.gmra.mxu0 %vm324_vm2, %v5484_v21 }
  0x48   : > { %4588 = vmatmul.mubr.msk.f32.gmra.mxu1 %vm324_vm2, %v5227_v31  ;;  %4646 = vmatprep.mubr.msk.f32.mxu0 %vm324_vm2, %v5490_v26 }
  0x49   : > { %4590 = vmatprep.mubr.msk.f32.mxu1 %vm324_vm2, %v5259_v45 }
  0x4b   : > { %4647 = vmatmul.mubr.msk.f32.gmra.mxu0 %vm324_vm2, %v5503_v32 }
  0x4c   : > { %4591 = vmatmul.mubr.msk.f32.gmra.mxu1 %vm324_vm2, %v5268_v49  ;;  %4649 = vmatprep.mubr.msk.f32.mxu0 %vm324_vm2, %v5511_v43 }
  0x4d   : > { %4593 = vmatprep.mubr.msk.f32.mxu1 %vm324_vm2, %v5288_v57 }
  0x4f   : > { %4650 = vmatmul.mubr.msk.f32.gmra.mxu0 %vm324_vm2, %v5530_v54 }
  0x50   : > { %4594 = vmatmul.mubr.msk.f32.gmra.mxu1 %vm324_vm2, %v5296_v61  ;;  %4652 = vmatprep.mubr.msk.f32.mxu0 %vm324_vm2, %v5541_v1 }
  0x51   : > { %4596 = vmatprep.mubr.msk.f32.mxu1 %vm324_vm2, %v5312_v12 }
  0x53   : > { %4653 = vmatmul.mubr.msk.f32.gmra.mxu0 %vm324_vm2, %v5551_v6 }
  0x54   : > { %4597 = vmatmul.mubr.msk.f32.gmra.mxu1 %vm324_vm2, %v5320_v19  ;;  %4655 = vmatprep.mubr.msk.f32.mxu0 %vm324_vm2, %v5557_v25 }
  0x55   : > { %4599 = vmatprep.mubr.msk.f32.mxu1 %vm324_vm2, %v5336_v33 }
  0x57   : > { %4656 = vmatmul.mubr.msk.f32.gmra.mxu0 %vm324_vm2, %v5567_v34 }
  0x58   : > { %4600 = vmatmul.mubr.msk.f32.gmra.mxu1 %vm324_vm2, %v5344_v39  ;;  %4658 = vmatprep.mubr.msk.f32.mxu0 %vm324_vm2, %v5573_v47 }
  0x59   : > { %4602 = vmatprep.mubr.msk.f32.mxu1 %vm324_vm2, %v5360_v52 }
  0x5b   : > { %4659 = vmatmul.mubr.msk.f32.gmra.mxu0 %vm324_vm2, %v5583_v40 }
  0x5c   : > { %4603 = vmatmul.mubr.msk.f32.gmra.mxu1 %vm324_vm2, %v5368_v56  ;;  %4661 = vmatprep.mubr.msk.f32.mxu0 %vm324_vm2, %v5589_v13 }
  0x5d   : > { %4605 = vmatprep.mubr.msk.f32.mxu1 %vm324_vm2, %v5174_v5 }
  0x5f   : > { %4662 = vmatmul.mubr.msk.f32.gmra.mxu0 %vm324_vm2, %v5599_v27 }
  0x60   : > { %4606 = vmatmul.mubr.msk.f32.gmra.mxu1 %vm324_vm2, %v5179_v8  ;;  %4664 = vmatprep.mubr.msk.f32.mxu0 %vm324_vm2, %v5605_v44  ;;  %v1022_v44 = vrot.slane %v5274_v50, 2 }
  0x61   : > { %4608 = vmatprep.mubr.msk.f32.mxu1 %vm324_vm2, %v5186_v11 }
  0x62   : > { %v5653_v10 = vsel %vm968_vm3, %v1020_v28, %v1022_v44 }
  0x63   : > { %4665 = vmatmul.mubr.msk.f32.gmra.mxu0 %vm324_vm2, %v5615_v55  ;;  %6880 = vst [vmem:[#allocation13_spill] sm:$0xff] %v5653_v10  ;;  %v1026_v55 = vrot.slane %v5300_v62, 2 }
  0x64   : > { %4609 = vmatmul.mubr.msk.f32.gmra.mxu1 %vm324_vm2, %v5195_v16  ;;  %4667 = vmatprep.mubr.msk.f32.mxu0 %vm324_vm2, %v5621_v9  ;;  %v1024_v9 = vrot.slane %v5293_v60, 2 }
  0x65   : > { %4611 = vmatprep.mubr.msk.f32.mxu1 %vm324_vm2, %v5205_v22 }
  0x66   : > { %v5663_v46 = vsel %vm968_vm3, %v1022_v44, %v1024_v9  ;;  %v5669_v28 = vsel %vm968_vm3, %v1024_v9, %v1026_v55 }
  0x67   : > { %4668 = vmatmul.mubr.msk.f32.gmra.mxu0 %vm324_vm2, %v5631_v42  ;;  %6881 = vst [vmem:[#allocation14_spill] sm:$0xff] %v5663_v46  ;;  %6882 = vst [vmem:[#allocation15_spill] sm:$0xff] %v5669_v28  ;;  %v1030_v42 = vrot.slane %v5324_v20, 2 }
  0x68   : > { %4612 = vmatmul.mubr.msk.f32.gmra.mxu1 %vm324_vm2, %v5211_v24  ;;  %4670 = vmatprep.mubr.msk.f32.mxu0 %vm324_vm2, %v5637_v51  ;;  %v1028_v51 = vrot.slane %v5317_v18, 2 }
  0x69   : > { %4614 = vmatprep.mubr.msk.f32.mxu1 %vm324_vm2, %v5224_v30 }
  0x6a   : > { %v5679_v44 = vsel %vm968_vm3, %v1026_v55, %v1028_v51  ;;  %v5685_v9 = vsel %vm968_vm3, %v1028_v51, %v1030_v42 }
  0x6b   : > { %4671 = vmatmul.mubr.msk.f32.gmra.mxu0 %vm324_vm2, %v5647_v37  ;;  %v1034_v37 = vrot.slane %v5348_v41, 2 }
  0x6c   : > { %4615 = vmatmul.mubr.msk.f32.gmra.mxu1 %vm324_vm2, %v5235_v35  ;;  %4673 = vmatprep.mubr.msk.f32.mxu0 %vm324_vm2, %v5653_v10  ;;  %v1032_v10 = vrot.slane %v5341_v38, 2 }
  0x6d   : > { %4617 = vmatprep.mubr.msk.f32.mxu1 %vm324_vm2, %v5265_v48 }
  0x6e   : > { %v5695_v55 = vsel %vm968_vm3, %v1030_v42, %v1032_v10  ;;  %v5701_v51 = vsel %vm968_vm3, %v1032_v10, %v1034_v37 }
  0x6f   : > { %4674 = vmatmul.mubr.msk.f32.gmra.mxu0 %vm324_vm2, %v5663_v46  ;;  %6883 = vst [vmem:[#allocation16_spill] sm:$0xff] %v5695_v55  ;;  %6884 = vst [vmem:[#allocation17_spill] sm:$0xff] %v5701_v51  ;;  %v1038_v46 = vrot.slane %v5372_v58, 2 }
  0x70   : > { %4618 = vmatmul.mubr.msk.f32.gmra.mxu1 %vm324_vm2, %v5274_v50  ;;  %4676 = vmatprep.mubr.msk.f32.mxu0 %vm324_vm2, %v5669_v28  ;;  %v1036_v28 = vrot.slane %v5363_v53, 2 }
  0x71   : > { %4620 = vmatprep.mubr.msk.f32.mxu1 %vm324_vm2, %v5293_v60 }
  0x72   : > { %v5711_v42 = vsel %vm968_vm3, %v1034_v37, %v1036_v28  ;;  %v5716_v10 = vsel %vm968_vm3, %v1036_v28, %v1038_v46  ;;  %v1702_v28 = vrot.slane %v5208_v23, 3  ;;  %v5751_v23 = vld [vmem:[%s6842_s1 + $0x1c] sm:$0xf] }
  0x73   : > { %4677 = vmatmul.mubr.msk.f32.gmra.mxu0 %vm324_vm2, %v5679_v44  ;;  %6885 = vst [vmem:[#allocation18_spill] sm:$0xff] %v5716_v10 }
  0x74   : > { %4621 = vmatmul.mubr.msk.f32.gmra.mxu1 %vm324_vm2, %v5300_v62  ;;  %4679 = vmatprep.mubr.msk.f32.mxu0 %vm324_vm2, %v5685_v9 }
  0x75   : > { %4623 = vmatprep.mubr.msk.f32.mxu1 %vm324_vm2, %v5317_v18 }
  0x77   : > { %4680 = vmatmul.mubr.msk.f32.gmra.mxu0 %vm324_vm2, %v5695_v55  ;;  %v1700_v55 = vrot.slane %v5198_v17, 3  ;;  %v1706_v17 = vrot.slane %v5227_v31, 3 }
  0x78   : > { %4624 = vmatmul.mubr.msk.f32.gmra.mxu1 %vm324_vm2, %v5324_v20  ;;  %4682 = vmatprep.mubr.msk.f32.mxu0 %vm324_vm2, %v5701_v51  ;;  %v6886_v51 = vrot.slane %v5386_v14, 2 }
  0x79   : > { %4626 = vmatprep.mubr.msk.f32.mxu1 %vm324_vm2, %v5341_v38 }
  0x7a   : > { %v5727_v37 = vsel %vm968_vm3, %v1038_v46, %v6886_v51  ;;  %v1704_v51 = vrot.slane %v5221_v29, 3 }
  0x7b   : > { %4683 = vmatmul.mubr.msk.f32.gmra.mxu0 %vm324_vm2, %v5711_v42  ;;  %6887 = vst [vmem:[#allocation19_spill] sm:$0xff] %v5727_v37 }
  0x7c   : > { %4627 = vmatmul.mubr.msk.f32.gmra.mxu1 %vm324_vm2, %v5348_v41  ;;  %4685 = vmatprep.mubr.msk.f32.mxu0 %vm324_vm2, %v5716_v10  ;;  %v6888_v10 = vrot.slane %v5192_v15, 3 }
  0x7d   : > { %4629 = vmatprep.mubr.msk.f32.mxu1 %vm324_vm2, %v5363_v53 }
  0x7e   : > { %v1701_v46 = vsel %vm1696_vm4, %v6888_v10, %v1700_v55  ;;  %v5762_v10 = vld [vmem:[%s6842_s1 + $0x20] sm:$0xf] }
  0x7f   : > { %4686 = vmatmul.mubr.msk.f32.gmra.mxu0 %vm324_vm2, %v5727_v37  ;;  %v1703_v37 = vsel %vm1696_vm4, %v1700_v55, %v1702_v28  ;;  %v1710_v55 = vrot.slane %v5268_v49, 3 }
  0x80   : > { %4630 = vmatmul.mubr.msk.f32.gmra.mxu1 %vm324_vm2, %v5372_v58  ;;  %4746 = vmatprep.mubr.msk.f32.mxu0 %vm324_vm2, %v5423_v59  ;;  %v1705_v59 = vsel %vm1696_vm4, %v1702_v28, %v1704_v51  ;;  %v1718_v28 = vrot.slane %v5320_v19, 3 }
  0x81   : > { %4690 = vmatprep.mubr.msk.f32.mxu1 %vm324_vm2, %v5427_v63  ;;  %v1708_v63 = vrot.slane %v5259_v45, 3 }
  0x83   : > { %4747 = vmatmul.mubr.msk.f32.vlgmr.msra.gmra.mxu0 %vm324_vm2, %v1701_v46  ;;  %v1720_v46 = vrot.slane %v5336_v33, 3 }
  0x84   : > { %4691 = vmatmul.mubr.msk.f32.vlgmr.msra.gmra.mxu1 %vm324_vm2, %v5439_v3  ;;  %4857 = vmatpush3.msk.msra.mxu0 %vm397_vm0, %v5445_v2  ;;  %v1707_v3 = vsel %vm1696_vm4, %v1704_v51, %v1706_v17  ;;  %v1712_v2 = vrot.slane %v5288_v57, 3  ;;  %v1722_v51 = vrot.slane %v5344_v39, 3 }
  0x85   : > { %4801 = vmatpush3.msk.msra.mxu1 %vm397_vm0, %v5432_v0  ;;  %4693 = vmatprep.mubr.msk.f32.mxu1 %vm324_vm2, %v5452_v4  ;;  %v1709_v0 = vsel %vm1696_vm4, %v1706_v17, %v1708_v63  ;;  %v1711_v4 = vsel %vm1696_vm4, %v1708_v63, %v1710_v55  ;;  %v1716_v17 = vrot.slane %v5312_v12, 3  ;;  %v1726_v63 = vrot.slane %v5368_v56, 3 }
  0x86   : > { %4749 = vmatprep.mubr.msk.f32.mxu0 %vm324_vm2, %v1703_v37  ;;  %4912 = vmatprep.subr.msk.mxu1 %vm397_vm0, %v5751_v23  ;;  %v1714_v37 = vrot.slane %v5296_v61, 3 }
  0x87   : > { %4750 = vmatmul.mubr.msk.f32.gmra.mxu0 %vm324_vm2, %v1705_v59  ;;  %4968 = vmatprep.subr.msk.mxu0 %vm397_vm0, %v5762_v10  ;;  %v1724_v59 = vrot.slane %v5360_v52, 3 }
  0x88   : > { %4694 = vmatmul.mubr.msk.f32.gmra.mxu1 %vm324_vm2, %v5468_v36  ;;  %4752 = vmatprep.mubr.msk.f32.mxu0 %vm324_vm2, %v1707_v3  ;;  %v1713_v36 = vsel %vm1696_vm4, %v1710_v55, %v1712_v2  ;;  %v1728_v3 = vrot.slane %v5174_v5, 3  ;;  %v1730_v55 = vrot.slane %v5179_v8, 3 }
  0x89   : > { %4696 = vmatprep.mubr.msk.f32.mxu1 %vm324_vm2, %v5474_v7  ;;  %v1715_v7 = vsel %vm1696_vm4, %v1712_v2, %v1714_v37  ;;  %v6889_v2 = vld [vmem:[#allocation7_spill] sm:$0xff] }
  0x8a   : > { %v1731_v5 = vsel %vm1696_vm4, %v1728_v3, %v1730_v55 }
  0x8b   : > { %4753 = vmatmul.mubr.msk.f32.gmra.mxu0 %vm324_vm2, %v1709_v0  ;;  %v1732_v0 = vrot.slane %v5186_v11, 3 }
  0x8c   : > { %4697 = vmatmul.mubr.msk.f32.gmra.mxu1 %vm324_vm2, %v5484_v21  ;;  %4755 = vmatprep.mubr.msk.f32.mxu0 %vm324_vm2, %v1711_v4  ;;  %v1717_v21 = vsel %vm1696_vm4, %v1714_v37, %v1716_v17  ;;  %v1744_v4 = vrot.slane %v5265_v48, 3  ;;  %v6891_v37 = vld [vmem:[#allocation9_spill] sm:$0xff] }
  0x8d   : > { %4699 = vmatprep.mubr.msk.f32.mxu1 %vm324_vm2, %v5490_v26  ;;  %v1719_v26 = vsel %vm1696_vm4, %v1716_v17, %v1718_v28  ;;  %v1733_v8 = vsel %vm1696_vm4, %v1730_v55, %v1732_v0  ;;  %v1758_v55 = vrot.slane %v5348_v41, 3 }
  0x8f   : > { %4756 = vmatmul.mubr.msk.f32.gmra.mxu0 %vm324_vm2, %v1713_v36  ;;  %v1746_v36 = vrot.slane %v5274_v50, 3  ;;  %v6894_v50 = vld [vmem:[#allocation12_spill] sm:$0xff] }
  0x90   : > { %4700 = vmatmul.mubr.msk.f32.gmra.mxu1 %vm324_vm2, %v5503_v32  ;;  %4758 = vmatprep.mubr.msk.f32.mxu0 %vm324_vm2, %v1715_v7  ;;  %v1721_v32 = vsel %vm1696_vm4, %v1718_v28, %v1720_v46  ;;  %v1748_v7 = vrot.slane %v5293_v60, 3  ;;  %v6893_v28 = vld [vmem:[#allocation11_spill] sm:$0xff] }
  0x91   : > { %4702 = vmatprep.mubr.msk.f32.mxu1 %vm324_vm2, %v5511_v43  ;;  %v1723_v43 = vsel %vm1696_vm4, %v1720_v46, %v1722_v51  ;;  %v1747_v48 = vsel %vm1696_vm4, %v1744_v4, %v1746_v36 }
  0x92   : > { %v1749_v46 = vsel %vm1696_vm4, %v1746_v36, %v1748_v7 }
  0x93   : > { %4759 = vmatmul.mubr.msk.f32.gmra.mxu0 %vm324_vm2, %v1717_v21  ;;  %v1750_v21 = vrot.slane %v5300_v62, 3 }
  0x94   : > { %4703 = vmatmul.mubr.msk.f32.gmra.mxu1 %vm324_vm2, %v5530_v54  ;;  %4761 = vmatprep.mubr.msk.f32.mxu0 %vm324_vm2, %v1719_v26  ;;  %v1725_v54 = vsel %vm1696_vm4, %v1722_v51, %v1724_v59  ;;  %v1752_v26 = vrot.slane %v5317_v18, 3  ;;  %v6895_v51 = vld [vmem:[#allocation13_spill] sm:$0xff] }
  0x95   : > { %4705 = vmatprep.mubr.msk.f32.mxu1 %vm324_vm2, %v5541_v1  ;;  %v1727_v1 = vsel %vm1696_vm4, %v1724_v59, %v1726_v63  ;;  %v1754_v59 = vrot.slane %v5324_v20, 3 }
  0x97   : > { %4762 = vmatmul.mubr.msk.f32.gmra.mxu0 %vm324_vm2, %v1721_v32  ;;  %v1751_v32 = vsel %vm1696_vm4, %v1748_v7, %v1750_v21  ;;  %v6905_v7 = vld [vmem:[#allocation5_spill] sm:$0xff] }
  0x98   : > { %4706 = vmatmul.mubr.msk.f32.gmra.mxu1 %vm324_vm2, %v5551_v6  ;;  %4764 = vmatprep.mubr.msk.f32.mxu0 %vm324_vm2, %v1723_v43  ;;  %v1729_v6 = vsel %vm1696_vm4, %v1726_v63, %v1728_v3  ;;  %v6896_v43 = vld [vmem:[#allocation14_spill] sm:$0xff]  ;;  %v1753_v63 = vsel %vm1696_vm4, %v1750_v21, %v1752_v26  ;;  %v6897_v3 = vld [vmem:[#allocation15_spill] sm:$0xff] }
  0x99   : > { %4708 = vmatprep.mubr.msk.f32.mxu1 %vm324_vm2, %v5557_v25  ;;  %v1734_v25 = vrot.slane %v5195_v16, 3 }
  0x9b   : > { %4765 = vmatmul.mubr.msk.f32.gmra.mxu0 %vm324_vm2, %v1725_v54  ;;  %v1735_v11 = vsel %vm1696_vm4, %v1732_v0, %v1734_v25  ;;  %v1756_v54 = vrot.slane %v5341_v38, 3  ;;  %v1760_v0 = vrot.slane %v5363_v53, 3 }
  0x9c   : > { %4709 = vmatmul.mubr.msk.f32.gmra.mxu1 %vm324_vm2, %v5567_v34  ;;  %4767 = vmatprep.mubr.msk.f32.mxu0 %vm324_vm2, %v1727_v1  ;;  %v1736_v34 = vrot.slane %v5205_v22, 3  ;;  %v1755_v1 = vsel %vm1696_vm4, %v1752_v26, %v1754_v59  ;;  %v6907_v26 = vld [vmem:[#allocation6_spill] sm:$0xff] }
  0x9d   : > { %4711 = vmatprep.mubr.msk.f32.mxu1 %vm324_vm2, %v5573_v47  ;;  %v1738_v47 = vrot.slane %v5211_v24, 3  ;;  %v6890_v24 = vld [vmem:[#allocation8_spill] sm:$0xff] }
  0x9e   : > { %v1737_v16 = vsel %vm1696_vm4, %v1734_v25, %v1736_v34  ;;  %v1762_v25 = vrot.slane %v5372_v58, 3 }
  0x9f   : > { %4768 = vmatmul.mubr.msk.f32.gmra.mxu0 %vm324_vm2, %v1729_v6  ;;  %v1739_v22 = vsel %vm1696_vm4, %v1736_v34, %v1738_v47  ;;  %v1757_v6 = vsel %vm1696_vm4, %v1754_v59, %v1756_v54  ;;  %v1764_v34 = vrot.slane %v5386_v14, 3  ;;  %v2141_v59 = vrot.slane %v5268_v49, 4 }
  0xa0   : > { %4712 = vmatmul.mubr.msk.f32.gmra.mxu1 %vm324_vm2, %v5583_v40  ;;  %4770 = vmatprep.mubr.msk.f32.mxu0 %vm324_vm2, %v1731_v5  ;;  %v1740_v40 = vrot.slane %v5224_v30, 3  ;;  %v1759_v5 = vsel %vm1696_vm4, %v1756_v54, %v1758_v55  ;;  %v2145_v49 = vrot.slane %v5296_v61, 4  ;;  %v2151_v54 = vrot.slane %v5336_v33, 4 }
  0xa1   : > { %4714 = vmatprep.mubr.msk.f32.mxu1 %vm324_vm2, %v5589_v13  ;;  %v1742_v13 = vrot.slane %v5235_v35, 3  ;;  %v6892_v35 = vld [vmem:[#allocation10_spill] sm:$0xff]  ;;  %v2155_v33 = vrot.slane %v5360_v52, 4 }
  0xa3   : > { %4771 = vmatmul.mubr.msk.f32.gmra.mxu0 %vm324_vm2, %v1733_v8  ;;  %v1743_v30 = vsel %vm1696_vm4, %v1740_v40, %v1742_v13  ;;  %v1745_v17 = vsel %vm1696_vm4, %v1742_v13, %v1744_v4  ;;  %v6898_v8 = vld [vmem:[#allocation16_spill] sm:$0xff]  ;;  %v6901_v13 = vld [vmem:[#allocation18_spill] sm:$0xff] }
  0xa4   : > { %4715 = vmatmul.mubr.msk.f32.gmra.mxu1 %vm324_vm2, %v5599_v27  ;;  %4773 = vmatprep.mubr.msk.f32.mxu0 %vm324_vm2, %v1735_v11  ;;  %v1741_v27 = vsel %vm1696_vm4, %v1738_v47, %v1740_v40  ;;  %v6899_v11 = vld [vmem:[#allocation17_spill] sm:$0xff]  ;;  %v6900_v47 = vld [vmem:[#allocation4_spill] sm:$0xff]  ;;  %v6902_v4 = vld [vmem:[#allocation2_spill] sm:$0xff] }
  0xa5   : > { %4717 = vmatprep.mubr.msk.f32.mxu1 %vm324_vm2, %v6889_v2  ;;  %v5916_v40 = vld [vmem:[%s5165_s22 + $0x130] sm:$0xff]  ;;  %v1765_v2 = vsel %vm1696_vm4, %v1762_v25, %v1764_v34 }
  0xa7   : > { %4774 = vmatmul.mubr.msk.f32.gmra.mxu0 %vm324_vm2, %v1737_v16  ;;  %v1766_v16 = vrot.slane %v6900_v47, 3 }
  0xa8   : > { %4718 = vmatmul.mubr.msk.f32.gmra.mxu1 %vm324_vm2, %v6890_v24  ;;  %4776 = vmatprep.mubr.msk.f32.mxu0 %vm324_vm2, %v1739_v22  ;;  %v1768_v22 = vrot.slane %v5916_v40, 3 }
  0xa9   : > { %4720 = vmatprep.mubr.msk.f32.mxu1 %vm324_vm2, %v6891_v37  ;;  %v1767_v24 = vsel %vm1696_vm4, %v1764_v34, %v1766_v16  ;;  %v2131_v37 = vrot.slane %v6902_v4, 4 }
  0xab   : > { %4777 = vmatmul.mubr.msk.f32.gmra.mxu0 %vm324_vm2, %v1741_v27  ;;  %v1404_v27 = vrot.slane %v5916_v40, 2 }
  0xac   : > { %4721 = vmatmul.mubr.msk.f32.gmra.mxu1 %vm324_vm2, %v6892_v35  ;;  %4779 = vmatprep.mubr.msk.f32.mxu0 %vm324_vm2, %v1743_v30  ;;  %v6903_v30 = vld [vmem:[#allocation3_spill] sm:$0xff]  ;;  %v1769_v35 = vsel %vm1696_vm4, %v1766_v16, %v1768_v22 }
  0xad   : > { %4723 = vmatprep.mubr.msk.f32.mxu1 %vm324_vm2, %v6893_v28  ;;  %v2133_v36 = vrot.slane %v6903_v30, 4  ;;  %v6906_v28 = vrot.slane %v6900_v47, 2 }
  0xaf   : > { %4780 = vmatmul.mubr.msk.f32.gmra.mxu0 %vm324_vm2, %v1745_v17  ;;  %v2135_v17 = vrot.slane %v5221_v29, 4  ;;  %v2134_v21 = vsel %vm397_vm0, %v2131_v37, %v2133_v36  ;;  %v2139_v29 = vrot.slane %v5259_v45, 4 }
  0xb0   : > { %4724 = vmatmul.mubr.msk.f32.gmra.mxu1 %vm324_vm2, %v6894_v50  ;;  %4782 = vmatprep.mubr.msk.f32.mxu0 %vm324_vm2, %v1747_v48  ;;  %v1405_v48 = vsel %vm968_vm3, %v6906_v28, %v1404_v27  ;;  %v2137_v50 = vrot.slane %v5227_v31, 4  ;;  %v6030_v27 = vld [vmem:[%s5165_s22 + $0xa0] sm:$0xff] }
  0xb1   : > { %4726 = vmatprep.mubr.msk.f32.mxu1 %vm324_vm2, %v6895_v51  ;;  %v6908_v51 = vrot.slane %v5192_v15, 4  ;;  %v2142_v15 = vsel %vm397_vm0, %v2139_v29, %v2141_v59  ;;  %v2163_v4 = vrot.slane %v6030_v27, 4 }
  0xb2   : > { %v2138_v31 = vsel %vm397_vm0, %v2135_v17, %v2137_v50  ;;  %v2140_v45 = vsel %vm397_vm0, %v2137_v50, %v2139_v29  ;;  %v6060_v29 = vld [vmem:[%s5165_s22 + $0xb8] sm:$0xff] }
  0xb3   : > { %4783 = vmatmul.mubr.msk.f32.gmra.mxu0 %vm324_vm2, %v1749_v46  ;;  %v2136_v46 = vsel %vm397_vm0, %v2133_v36, %v2135_v17  ;;  %v6038_v36 = vld [vmem:[%s5165_s22 + $0xa8] sm:$0xff] }
  0xb4   : > { %4727 = vmatmul.mubr.msk.f32.gmra.mxu1 %vm324_vm2, %v6896_v43  ;;  %4785 = vmatprep.mubr.msk.f32.mxu0 %vm324_vm2, %v1751_v32  ;;  %v2132_v32 = vsel %vm397_vm0, %v6908_v51, %v2131_v37  ;;  %v2143_v43 = vrot.slane %v5288_v57, 4  ;;  %v2147_v57 = vrot.slane %v5312_v12, 4 }
  0xb5   : > { %4729 = vmatprep.mubr.msk.f32.mxu1 %vm324_vm2, %v6897_v3  ;;  %v2153_v3 = vrot.slane %v5344_v39, 4 }
  0xb6   : > { %v2148_v61 = vsel %vm397_vm0, %v2145_v49, %v2147_v57 }
  0xb7   : > { %4786 = vmatmul.mubr.msk.f32.gmra.mxu0 %vm324_vm2, %v1753_v63  ;;  %v2149_v63 = vrot.slane %v5320_v19, 4  ;;  %v2154_v39 = vsel %vm397_vm0, %v2151_v54, %v2153_v3  ;;  %v2156_v52 = vsel %vm397_vm0, %v2153_v3, %v2155_v33 }
  0xb8   : > { %4730 = vmatmul.mubr.msk.f32.gmra.mxu1 %vm324_vm2, %v5679_v44  ;;  %4788 = vmatprep.mubr.msk.f32.mxu0 %vm324_vm2, %v1755_v1  ;;  %v1761_v44 = vsel %vm1696_vm4, %v1758_v55, %v1760_v0 }
  0xb9   : > { %4732 = vmatprep.mubr.msk.f32.mxu1 %vm324_vm2, %v5685_v9  ;;  %v1763_v9 = vsel %vm1696_vm4, %v1760_v0, %v1762_v25  ;;  %v2150_v12 = vsel %vm397_vm0, %v2147_v57, %v2149_v63  ;;  %v2152_v55 = vsel %vm397_vm0, %v2149_v63, %v2151_v54  ;;  %v2157_v0 = vrot.slane %v5368_v56, 4 }
  0xbb   : > { %4789 = vmatmul.mubr.msk.f32.gmra.mxu0 %vm324_vm2, %v1757_v6 }
  0xbc   : > { %4733 = vmatmul.mubr.msk.f32.gmra.mxu1 %vm324_vm2, %v6898_v8  ;;  %4791 = vmatprep.mubr.msk.f32.mxu0 %vm324_vm2, %v1759_v5 }
  0xbd   : > { %4735 = vmatprep.mubr.msk.f32.mxu1 %vm324_vm2, %v6899_v11  ;;  %v2158_v11 = vsel %vm397_vm0, %v2155_v33, %v2157_v0 }
  0xbf   : > { %4792 = vmatmul.mubr.msk.f32.gmra.mxu0 %vm324_vm2, %v1761_v44  ;;  %v6008_v44 = vld [vmem:[%s5165_s22 + $0x90] sm:$0xff] }
  0xc0   : > { %4736 = vmatmul.mubr.msk.f32.gmra.mxu1 %vm324_vm2, %v5711_v42  ;;  %4794 = vmatprep.mubr.msk.f32.mxu0 %vm324_vm2, %v1763_v9  ;;  %v6904_v42 = vld [vmem:[#allocation19_spill] sm:$0xff]  ;;  %v2159_v34 = vrot.slane %v6008_v44, 4  ;;  %v6016_v9 = vld [vmem:[%s5165_s22 + $0x98] sm:$0xff] }
  0xc1   : > { %4738 = vmatprep.mubr.msk.f32.mxu1 %vm324_vm2, %v6901_v13  ;;  %v2161_v16 = vrot.slane %v6016_v9, 4 }
  0xc3   : > { %4795 = vmatmul.mubr.msk.f32.gmra.mxu0 %vm324_vm2, %v1765_v2  ;;  %v2162_v30 = vsel %vm397_vm0, %v2159_v34, %v2161_v16  ;;  %v2164_v28 = vsel %vm397_vm0, %v2161_v16, %v2163_v4 }
  0xc4   : > { %4739 = vmatmul.mubr.msk.f32.gmra.mxu1 %vm324_vm2, %v6904_v42  ;;  %4797 = vmatprep.mubr.msk.f32.mxu0 %vm324_vm2, %v1767_v24  ;;  %v2160_v24 = vsel %vm397_vm0, %v2157_v0, %v2159_v34  ;;  %v2165_v42 = vrot.slane %v6038_v36, 4 }
  0xc5   : > { %4741 = vmatprep.mubr.msk.f32.mxu1 %vm324_vm2, %v6905_v7 }
  0xc7   : > { %4798 = vmatmul.mubr.msk.f32.gmra.mxu0 %vm324_vm2, %v1769_v35 }
  0xc8   : > { %4742 = vmatmul.mubr.msk.f32.gmra.mxu1 %vm324_vm2, %v1405_v48  ;;  %4858 = vmatprep.mubr.msk.f32.mxu0 %vm324_vm2, %v2134_v21  ;;  %v6052_v48 = vld [vmem:[%s5165_s22 + $0xb0] sm:$0xff] }
  0xc9   : > { %4802 = vmatprep.mubr.msk.f32.mxu1 %vm324_vm2, %v6907_v26  ;;  %v2169_v26 = vrot.slane %v6060_v29, 4 }
  0xcb   : > { %4859 = vmatmul.mubr.msk.f32.vlgmr.msra.gmra.mxu0 %vm324_vm2, %v2136_v46 }
  0xcc   : > { %4803 = vmatmul.mubr.msk.f32.vlgmr.msra.gmra.mxu1 %vm324_vm2, %v2132_v32  ;;  %4969 = vmatpush3.msk.msra.mxu0 %vm397_vm0, %v5762_v10  ;;  %v2144_v10 = vsel %vm397_vm0, %v2141_v59, %v2143_v43 }
  0xcd   : > { %4913 = vmatpush3.msk.msra.mxu1 %vm397_vm0, %v5751_v23  ;;  %4805 = vmatprep.mubr.msk.f32.mxu1 %vm324_vm2, %v2134_v21  ;;  %v2146_v23 = vsel %vm397_vm0, %v2143_v43, %v2145_v49  ;;  %v2167_v21 = vrot.slane %v6052_v48, 4 }
  0xce   : > { %4861 = vmatprep.mubr.msk.f32.mxu0 %vm324_vm2, %v2138_v31 }
  0xcf   : > { %4862 = vmatmul.mubr.msk.f32.gmra.mxu0 %vm324_vm2, %v2140_v45  ;;  %v2170_v49 = vsel %vm397_vm0, %v2167_v21, %v2169_v26 }
  0xd0   : > { %4806 = vmatmul.mubr.msk.f32.gmra.mxu1 %vm324_vm2, %v2136_v46  ;;  %4864 = vmatprep.mubr.msk.f32.mxu0 %vm324_vm2, %v2142_v15  ;;  %v2166_v46 = vsel %vm397_vm0, %v2163_v4, %v2165_v42 }
  0xd1   : > { %4808 = vmatprep.mubr.msk.f32.mxu1 %vm324_vm2, %v2138_v31  ;;  %v2168_v31 = vsel %vm397_vm0, %v2165_v42, %v2167_v21  ;;  %v2181_v42 = vrot.slane %v5300_v62, 4 }
  0xd3   : > { %4865 = vmatmul.mubr.msk.f32.gmra.mxu0 %vm324_vm2, %v2144_v10 }
  0xd4   : > { %4809 = vmatmul.mubr.msk.f32.gmra.mxu1 %vm324_vm2, %v2140_v45  ;;  %4867 = vmatprep.mubr.msk.f32.mxu0 %vm324_vm2, %v2146_v23  ;;  %v6074_v45 = vld [vmem:[%s5165_s22 + $0xc0] sm:$0xff] }
  0xd5   : > { %4811 = vmatprep.mubr.msk.f32.mxu1 %vm324_vm2, %v2142_v15  ;;  %v2171_v43 = vrot.slane %v6074_v45, 4 }
  0xd7   : > { %v5983_v1 = vpop.f32.mrf.mxu0  ;;  %4868 = vmatmul.mubr.msk.f32.gmra.mxu0 %vm324_vm2, %v2148_v61  ;;  %v2172_v54 = vsel %vm397_vm0, %v2169_v26, %v2171_v43  ;;  %v2183_v26 = vrot.slane %v5317_v18, 4 }
  0xd8   : > { %v5986_v19 = vpop.f32.mrf.mxu1  ;;  %4812 = vmatmul.mubr.msk.f32.gmra.mxu1 %vm324_vm2, %v2144_v10  ;;  %4870 = vmatprep.mubr.msk.f32.mxu0 %vm324_vm2, %v2150_v12  ;;  %v6082_v10 = vld [vmem:[%s5165_s22 + $0xc8] sm:$0xff] }
  0xd9   : > { %v5992_v6 = vpop.f32.mrf.mxu0  ;;  %4814 = vmatprep.mubr.msk.f32.mxu1 %vm324_vm2, %v2146_v23  ;;  %v2173_v57 = vrot.slane %v6082_v10, 4  ;;  %v2184_v18 = vsel %vm397_vm0, %v2181_v42, %v2183_v26 }
  0xda   : > { %v5997_v5 = vpop.f32.mrf.mxu1 }
  0xdb   : > { %v5999_v25 = vpop.f32.mrf.mxu0  ;;  %4871 = vmatmul.mubr.msk.f32.gmra.mxu0 %vm324_vm2, %v2152_v55  ;;  %v2174_v33 = vsel %vm397_vm0, %v2171_v43, %v2173_v57  ;;  %v2185_v43 = vrot.slane %v5324_v20, 4 }
  0xdc   : > { %v6002_v8 = vpop.f32.mrf.mxu1  ;;  %4815 = vmatmul.mubr.msk.f32.gmra.mxu1 %vm324_vm2, %v2148_v61  ;;  %4873 = vmatprep.mubr.msk.f32.mxu0 %vm324_vm2, %v2154_v39 }
  0xdd   : > { %v6011_v56 = vpop.f32.mrf.mxu0  ;;  %4817 = vmatprep.mubr.msk.f32.mxu1 %vm324_vm2, %v2150_v12  ;;  %v6096_v12 = vld [vmem:[%s5165_s22 + $0xd0] sm:$0xff]  ;;  %v2186_v20 = vsel %vm397_vm0, %v2183_v26, %v2185_v43  ;;  %v2193_v26 = vrot.slane %v5372_v58, 4 }
  0xde   : > { %v6019_v2 = vpop.f32.mrf.mxu1  ;;  %v2175_v3 = vrot.slane %v6096_v12, 4 }
  0xdf   : > { %v6021_v22 = vpop.f32.mrf.mxu0  ;;  %4874 = vmatmul.mubr.msk.f32.gmra.mxu0 %vm324_vm2, %v2156_v52 }
  0xe0   : > { %v6024_v13 = vpop.f32.mrf.mxu1  ;;  %4818 = vmatmul.mubr.msk.f32.gmra.mxu1 %vm324_vm2, %v2152_v55  ;;  %4876 = vmatprep.mubr.msk.f32.mxu0 %vm324_vm2, %v2158_v11  ;;  %v2176_v16 = vsel %vm397_vm0, %v2173_v57, %v2175_v3 }
  0xe1   : > { %v6033_v37 = vpop.f32.mrf.mxu0  ;;  %4820 = vmatprep.mubr.msk.f32.mxu1 %vm324_vm2, %v2154_v39  ;;  %v6104_v39 = vld [vmem:[%s5165_s22 + $0xd8] sm:$0xff] }
  0xe2   : > { %v6041_v35 = vpop.f32.mrf.mxu1  ;;  %v2177_v0 = vrot.slane %v6104_v39, 4 }
  0xe3   : > { %v6043_v17 = vpop.f32.mrf.mxu0  ;;  %4877 = vmatmul.mubr.msk.f32.gmra.mxu0 %vm324_vm2, %v2160_v24 }
  0xe4   : > { %v6046_v7 = vpop.f32.mrf.mxu1  ;;  %4821 = vmatmul.mubr.msk.f32.gmra.mxu1 %vm324_vm2, %v2156_v52  ;;  %4879 = vmatprep.mubr.msk.f32.mxu0 %vm324_vm2, %v2162_v30 }
  0xe5   : > { %v6055_v50 = vpop.f32.mrf.mxu0  ;;  %4823 = vmatprep.mubr.msk.f32.mxu1 %vm324_vm2, %v2158_v11 }
  0xe6   : > { %v6063_v51 = vpop.f32.mrf.mxu1 }
  0xe7   : > { %v6065_v32 = vpop.f32.mrf.mxu0  ;;  %4880 = vmatmul.mubr.msk.f32.gmra.mxu0 %vm324_vm2, %v2164_v28 }
  0xe8   : > { %v6068_v59 = vpop.f32.mrf.mxu1  ;;  %4824 = vmatmul.mubr.msk.f32.gmra.mxu1 %vm324_vm2, %v2160_v24  ;;  %4882 = vmatprep.mubr.msk.f32.mxu0 %vm324_vm2, %v2166_v46  ;;  %v2179_v24 = vrot.slane %v5293_v60, 4 }
  0xe9   : > { %v6077_v15 = vpop.f32.mrf.mxu0  ;;  %4826 = vmatprep.mubr.msk.f32.mxu1 %vm324_vm2, %v2162_v30  ;;  %v2178_v30 = vsel %vm397_vm0, %v2175_v3, %v2177_v0  ;;  %v2187_v3 = vrot.slane %v5341_v38, 4 }
  0xea   : > { %v6085_v23 = vpop.f32.mrf.mxu1  ;;  %v2180_v60 = vsel %vm397_vm0, %v2177_v0, %v2179_v24  ;;  %v2182_v62 = vsel %vm397_vm0, %v2179_v24, %v2181_v42  ;;  %v2189_v0 = vrot.slane %v5348_v41, 4  ;;  %v2191_v42 = vrot.slane %v5363_v53, 4 }
  0xeb   : > { %v6087_v63 = vpop.f32.mrf.mxu0  ;;  %4883 = vmatmul.mubr.msk.f32.gmra.mxu0 %vm324_vm2, %v2168_v31  ;;  %v2188_v38 = vsel %vm397_vm0, %v2185_v43, %v2187_v3 }
  0xec   : > { %v6090_v61 = vpop.f32.mrf.mxu1  ;;  %4827 = vmatmul.mubr.msk.f32.gmra.mxu1 %vm324_vm2, %v2164_v28  ;;  %4885 = vmatprep.mubr.msk.f32.mxu0 %vm324_vm2, %v2170_v49  ;;  %v2190_v41 = vsel %vm397_vm0, %v2187_v3, %v2189_v0  ;;  %v2192_v53 = vsel %vm397_vm0, %v2189_v0, %v2191_v42  ;;  %v2197_v3 = vrot.slane %v6900_v47, 4  ;;  %v2199_v47 = vrot.slane %v5916_v40, 4 }
  0xed   : > { %v6099_v55 = vpop.f32.mrf.mxu0  ;;  %4829 = vmatprep.mubr.msk.f32.mxu1 %vm324_vm2, %v2166_v46 }
  0xee   : > { %v6107_v52 = vpop.f32.mrf.mxu1 }
  0xef   : > { %v6109_v34 = vpop.f32.mrf.mxu0  ;;  %4886 = vmatmul.mubr.msk.f32.gmra.mxu0 %vm324_vm2, %v2172_v54 }
  0xf0   : > { %v6112_v11 = vpop.f32.mrf.mxu1  ;;  %4830 = vmatmul.mubr.msk.f32.gmra.mxu1 %vm324_vm2, %v2168_v31  ;;  %4888 = vmatprep.mubr.msk.f32.mxu0 %vm324_vm2, %v2174_v33 }
  0xf1   : > { %v6118_v4 = vpop.f32.mrf.mxu0  ;;  %4832 = vmatprep.mubr.msk.f32.mxu1 %vm324_vm2, %v2170_v49 }
  0xf2   : > { %v6123_v28 = vpop.f32.mrf.mxu1 }
  0xf3   : > { %6909 = vst [vmem:[#allocation7_spill] sm:$0xff] %v6123_v28  ;;  %v6125_v21 = vpop.f32.mrf.mxu0  ;;  %4889 = vmatmul.mubr.msk.f32.gmra.mxu0 %vm324_vm2, %v2176_v16 }
  0xf4   : > { %v6128_v46 = vpop.f32.mrf.mxu1  ;;  %4833 = vmatmul.mubr.msk.f32.gmra.mxu1 %vm324_vm2, %v2172_v54  ;;  %4891 = vmatprep.mubr.msk.f32.mxu0 %vm324_vm2, %v2178_v30 }
  0xf5   : > { %6910 = vst [vmem:[#allocation8_spill] sm:$0xff] %v6128_v46  ;;  %v6134_v31 = vpop.f32.mrf.mxu0  ;;  %4835 = vmatprep.mubr.msk.f32.mxu1 %vm324_vm2, %v2174_v33 }
  0xf6   : > { %v6139_v49 = vpop.f32.mrf.mxu1 }
  0xf7   : > { %6911 = vst [vmem:[#allocation9_spill] sm:$0xff] %v6139_v49  ;;  %v6141_v57 = vpop.f32.mrf.mxu0  ;;  %4892 = vmatmul.mubr.msk.f32.gmra.mxu0 %vm324_vm2, %v2180_v60 }
  0xf8   : > { %v6144_v54 = vpop.f32.mrf.mxu1  ;;  %4836 = vmatmul.mubr.msk.f32.gmra.mxu1 %vm324_vm2, %v2176_v16  ;;  %4894 = vmatprep.mubr.msk.f32.mxu0 %vm324_vm2, %v2182_v62 }
  0xf9   : > { %6912 = vst [vmem:[#allocation10_spill] sm:$0xff] %v6144_v54  ;;  %v6150_v33 = vpop.f32.mrf.mxu0  ;;  %4838 = vmatprep.mubr.msk.f32.mxu1 %vm324_vm2, %v2178_v30 }
  0xfa   : > { %v6155_v24 = vpop.f32.mrf.mxu1 }
  0xfb   : > { %6913 = vst [vmem:[#allocation11_spill] sm:$0xff] %v6155_v24  ;;  %v4636_v49 = vpop.f32.mrf.mxu0  ;;  %4895 = vmatmul.mubr.msk.f32.gmra.mxu0 %vm324_vm2, %v2184_v18 }
  0xfc   : > { %v4580_v16 = vpop.f32.mrf.mxu1  ;;  %4839 = vmatmul.mubr.msk.f32.gmra.mxu1 %vm324_vm2, %v2180_v60  ;;  %4897 = vmatprep.mubr.msk.f32.mxu0 %vm324_vm2, %v2186_v20 }
  0xfd   : > { %v793_v30 = vadd.f32 %v4580_v16, %v5983_v1  ;;  %v1183_v54 = vpop.f32.mrf.mxu0  ;;  %4841 = vmatprep.mubr.msk.f32.mxu1 %vm324_vm2, %v2182_v62  ;;  %v2195_v1 = vrot.slane %v5386_v14, 4 }
  0xfe   : > { %v787_v24 = vpop.f32.mrf.mxu1 }
  0xff   : > { %v6166_v46 = vadd.f32 %v4636_v49, %v793_v30  ;;  %v788_v60 = vadd.f32 %v787_v24, %v5992_v6  ;;  %v4639_v28 = vpop.f32.mrf.mxu0  ;;  %4898 = vmatmul.mubr.msk.f32.gmra.mxu0 %vm324_vm2, %v2188_v38  ;;  %v2194_v6 = vsel %vm397_vm0, %v2191_v42, %v2193_v26  ;;  %v6181_v24 = vld [vmem:[%s5165_s22 + $0x138] sm:$0xff] }
 0x100   : > { %v4583_v43 = vpop.f32.mrf.mxu1  ;;  %4842 = vmatmul.mubr.msk.f32.gmra.mxu1 %vm324_vm2, %v2184_v18  ;;  %4900 = vmatprep.mubr.msk.f32.mxu0 %vm324_vm2, %v2190_v41  ;;  %6914 = vst [vmem:[#allocation12_spill] sm:$0xff] %v6181_v24 }
 0x101   : > { %v6174_v62 = vadd.f32 %v1183_v54, %v788_v60  ;;  %v803_v58 = vadd.f32 %v4583_v43, %v5999_v25  ;;  %v1193_v49 = vpop.f32.mrf.mxu0  ;;  %4844 = vmatprep.mubr.msk.f32.mxu1 %vm324_vm2, %v2186_v20  ;;  %v2196_v25 = vsel %vm397_vm0, %v2193_v26, %v2195_v1  ;;  %v2561_v20 = vrot.slane %v6181_v24, 4  ;;  %v6198_v60 = vld [vmem:[%s5165_s22 + $0x140] sm:$0xff] }
 0x102   : > { %v797_v18 = vpop.f32.mrf.mxu1  ;;  %6915 = vst [vmem:[#allocation13_spill] sm:$0xff] %v6198_v60 }
 0x103   : > { %v6183_v16 = vadd.f32 %v4639_v28, %v803_v58  ;;  %v798_v0 = vadd.f32 %v797_v18, %v6011_v56  ;;  %v4642_v14 = vpop.f32.mrf.mxu0  ;;  %4901 = vmatmul.mubr.msk.f32.gmra.mxu0 %vm324_vm2, %v2192_v53  ;;  %v2198_v56 = vsel %vm397_vm0, %v2195_v1, %v2197_v3  ;;  %v2563_v1 = vrot.slane %v6198_v60, 4 }
 0x104   : > { %v4586_v54 = vpop.f32.mrf.mxu1  ;;  %4845 = vmatmul.mubr.msk.f32.gmra.mxu1 %vm324_vm2, %v2188_v38  ;;  %4903 = vmatprep.mubr.msk.f32.mxu0 %vm324_vm2, %v2194_v6 }
 0x105   : > { %v6192_v42 = vadd.f32 %v1193_v49, %v798_v0  ;;  %v813_v28 = vadd.f32 %v4586_v54, %v6021_v22  ;;  %v1203_v30 = vpop.f32.mrf.mxu0  ;;  %4847 = vmatprep.mubr.msk.f32.mxu1 %vm324_vm2, %v2190_v41  ;;  %v2200_v22 = vsel %vm397_vm0, %v2197_v3, %v2199_v47  ;;  %v2562_v41 = vsel %vm397_vm0, %v2199_v47, %v2561_v20  ;;  %v5063_v54 = vld [vmem:[%s5165_s22 + $0x28] sm:$0xff] }
 0x106   : > { %v807_v38 = vpop.f32.mrf.mxu1  ;;  %v2857_v24 = vrot.slane %v5063_v54, 5 }
 0x107   : > { %v6200_v43 = vadd.f32 %v4642_v14, %v813_v28  ;;  %v808_v40 = vadd.f32 %v807_v38, %v6033_v37  ;;  %v4645_v26 = vpop.f32.mrf.mxu0  ;;  %4904 = vmatmul.mubr.msk.f32.gmra.mxu0 %vm324_vm2, %v2196_v25  ;;  %v5062_v37 = vld [vmem:[%s5165_s22 + $0x20] sm:$0xff] }
 0x108   : > { %v4589_v58 = vpop.f32.mrf.mxu1  ;;  %4848 = vmatmul.mubr.msk.f32.gmra.mxu1 %vm324_vm2, %v2192_v53  ;;  %4906 = vmatprep.mubr.msk.f32.mxu0 %vm324_vm2, %v2198_v56  ;;  %v3288_v14 = vrot.slane %v5062_v37, 6  ;;  %v3289_v53 = vrot.slane %v5063_v54, 6  ;;  %v2856_v38 = vrot.slane %v5062_v37, 5 }
 0x109   : > { %v6209_v49 = vadd.f32 %v1203_v30, %v808_v40  ;;  %v823_v18 = vadd.f32 %v4589_v58, %v6043_v17  ;;  %v1213_v0 = vpop.f32.mrf.mxu0  ;;  %4850 = vmatprep.mubr.msk.f32.mxu1 %vm324_vm2, %v2194_v6  ;;  %v2564_v6 = vsel %vm397_vm0, %v2561_v20, %v2563_v1  ;;  %v5064_v40 = vld [vmem:[%s5165_s22 + $0x30] sm:$0xff] }
 0x10a   : > { %v817_v28 = vpop.f32.mrf.mxu1  ;;  %v2859_v58 = vrot.slane %v5064_v40, 5  ;;  %v3291_v37 = vrot.slane %v5064_v40, 6 }
 0x10b   : > { %v6215_v3 = vadd.f32 %v4645_v26, %v823_v18  ;;  %v818_v47 = vadd.f32 %v817_v28, %v6055_v50  ;;  %v4648_v30 = vpop.f32.mrf.mxu0  ;;  %4907 = vmatmul.mubr.msk.f32.gmra.mxu0 %vm324_vm2, %v2200_v22  ;;  %v3290_v18 = vsel %vm3287_vm5, %v3288_v14, %v3289_v53  ;;  %v5065_v28 = vld [vmem:[%s5165_s22 + $0x38] sm:$0xff] }
 0x10c   : > { %v4592_v17 = vpop.f32.mrf.mxu1  ;;  %4851 = vmatmul.mubr.msk.f32.gmra.mxu1 %vm324_vm2, %v2196_v25  ;;  %4909 = vmatprep.mubr.msk.f32.mxu0 %vm324_vm2, %v2562_v41  ;;  %v2858_v41 = vsel %vm2855_vm6, %v2856_v38, %v2857_v24  ;;  %v2861_v60 = vrot.slane %v5065_v28, 5  ;;  %v3292_v14 = vsel %vm3287_vm5, %v3289_v53, %v3291_v37 }
 0x10d   : > { %6916 = vst [vmem:[#allocation14_spill] sm:$0xff] %v6215_v3  ;;  %v6223_v54 = vadd.f32 %v1213_v0, %v818_v47  ;;  %v833_v26 = vadd.f32 %v4592_v17, %v6065_v32  ;;  %v1223_v50 = vpop.f32.mrf.mxu0  ;;  %4853 = vmatprep.mubr.msk.f32.mxu1 %vm324_vm2, %v2198_v56  ;;  %v3293_v3 = vrot.slane %v5065_v28, 6  ;;  %v2860_v56 = vsel %vm2855_vm6, %v2857_v24, %v2859_v58  ;;  %v5066_v47 = vld [vmem:[%s5165_s22 + $0x40] sm:$0xff] }
 0x10e   : > { %v827_v25 = vpop.f32.mrf.mxu1  ;;  %v2863_v38 = vrot.slane %v5066_v47, 5  ;;  %v3295_v17 = vrot.slane %v5066_v47, 6  ;;  %v2862_v24 = vsel %vm2855_vm6, %v2859_v58, %v2861_v60 }
 0x10f   : > { %v6230_v20 = vadd.f32 %v4648_v30, %v833_v26  ;;  %v828_v1 = vadd.f32 %v827_v25, %v6077_v15  ;;  %v4651_v0 = vpop.f32.mrf.mxu0  ;;  %4910 = vmatmul.mubr.msk.f32.gmra.mxu0 %vm324_vm2, %v2564_v6  ;;  %v3294_v6 = vsel %vm3287_vm5, %v3291_v37, %v3293_v3 }
 0x110   : > { %v4595_v32 = vpop.f32.mrf.mxu1  ;;  %4854 = vmatmul.mubr.msk.f32.gmra.mxu1 %vm324_vm2, %v2200_v22  ;;  %4970 = vmatprep.mubr.msk.f32.mxu0 %vm324_vm2, %v3290_v18  ;;  %v5067_v22 = vld [vmem:[%s5165_s22 + $0x48] sm:$0xff]  ;;  %v2864_v37 = vsel %vm2855_vm6, %v2861_v60, %v2863_v38 }
 0x111   : > { %v6239_v30 = vadd.f32 %v1223_v50, %v828_v1  ;;  %v843_v15 = vadd.f32 %v4595_v32, %v6087_v63  ;;  %v1233_v40 = vpop.f32.mrf.mxu0  ;;  %4914 = vmatprep.mubr.msk.f32.mxu1 %vm324_vm2, %v2858_v41  ;;  %v3297_v26 = vrot.slane %v5067_v22, 6  ;;  %v2865_v28 = vrot.slane %v5067_v22, 5  ;;  %v5068_v1 = vld [vmem:[%s5165_s22 + $0x50] sm:$0xff] }
 0x112   : > { %v837_v18 = vpop.f32.mrf.mxu1  ;;  %v3296_v41 = vsel %vm3287_vm5, %v3293_v3, %v3295_v17  ;;  %v2867_v58 = vrot.slane %v5068_v1, 5  ;;  %v3299_v32 = vrot.slane %v5068_v1, 6 }
 0x113   : > { %v6246_v53 = vadd.f32 %v4651_v0, %v843_v15  ;;  %v838_v25 = vadd.f32 %v837_v18, %v6099_v55  ;;  %v4654_v50 = vpop.f32.mrf.mxu0  ;;  %4971 = vmatmul.mubr.msk.f32.vlgmr.msra.gmra.mxu0 %vm324_vm2, %v3292_v14  ;;  %v3298_v14 = vsel %vm3287_vm5, %v3295_v17, %v3297_v26  ;;  %v2866_v60 = vsel %vm2855_vm6, %v2863_v38, %v2865_v28 }
 0x114   : > { %v4598_v63 = vpop.f32.mrf.mxu1  ;;  %4915 = vmatmul.mubr.msk.f32.vlgmr.msra.gmra.mxu1 %vm324_vm2, %v2860_v56  ;;  %4973 = vmatprep.mubr.msk.f32.mxu0 %vm324_vm2, %v3294_v6  ;;  %v5069_v56 = vld [vmem:[%s5165_s22 + $0x58] sm:$0xff]  ;;  %v2868_v17 = vsel %vm2855_vm6, %v2865_v28, %v2867_v58 }
 0x115   : > { %v6255_v0 = vadd.f32 %v1233_v40, %v838_v25  ;;  %v853_v55 = vadd.f32 %v4598_v63, %v6109_v34  ;;  %v1243_v47 = vpop.f32.mrf.mxu0  ;;  %4917 = vmatprep.mubr.msk.f32.mxu1 %vm324_vm2, %v2862_v24  ;;  %v3301_v15 = vrot.slane %v5069_v56, 6  ;;  %v2869_v22 = vrot.slane %v5069_v56, 5  ;;  %v5070_v25 = vld [vmem:[%s5165_s22 + $0x60] sm:$0xff] }
 0x116   : > { %v847_v6 = vpop.f32.mrf.mxu1  ;;  %v3300_v24 = vsel %vm3287_vm5, %v3297_v26, %v3299_v32  ;;  %v2871_v38 = vrot.slane %v5070_v25, 5  ;;  %v3303_v63 = vrot.slane %v5070_v25, 6 }
 0x117   : > { %v6262_v3 = vadd.f32 %v4654_v50, %v853_v55  ;;  %v848_v18 = vadd.f32 %v847_v6, %v6118_v4  ;;  %v4657_v40 = vpop.f32.mrf.mxu0  ;;  %4974 = vmatmul.mubr.msk.f32.gmra.mxu0 %vm324_vm2, %v3296_v41  ;;  %v3302_v41 = vsel %vm3287_vm5, %v3299_v32, %v3301_v15  ;;  %v2870_v28 = vsel %vm2855_vm6, %v2867_v58, %v2869_v22 }
 0x118   : > { %v4601_v34 = vpop.f32.mrf.mxu1  ;;  %4918 = vmatmul.mubr.msk.f32.gmra.mxu1 %vm324_vm2, %v2864_v37  ;;  %4976 = vmatprep.mubr.msk.f32.mxu0 %vm324_vm2, %v3298_v14  ;;  %v5071_v37 = vld [vmem:[%s5165_s22 + $0x68] sm:$0xff]  ;;  %v2872_v32 = vsel %vm2855_vm6, %v2869_v22, %v2871_v38 }
 0x119   : > { %v6271_v50 = vadd.f32 %v1243_v47, %v848_v18  ;;  %v863_v4 = vadd.f32 %v4601_v34, %v6125_v21  ;;  %v1253_v1 = vpop.f32.mrf.mxu0  ;;  %4920 = vmatprep.mubr.msk.f32.mxu1 %vm324_vm2, %v2866_v60  ;;  %v3305_v55 = vrot.slane %v5071_v37, 6  ;;  %v2873_v56 = vrot.slane %v5071_v37, 5  ;;  %v5072_v18 = vld [vmem:[%s5165_s22 + $0x70] sm:$0xff] }
 0x11a   : > { %v857_v14 = vpop.f32.mrf.mxu1  ;;  %v3304_v60 = vsel %vm3287_vm5, %v3301_v15, %v3303_v63  ;;  %v2875_v58 = vrot.slane %v5072_v18, 5  ;;  %v3307_v34 = vrot.slane %v5072_v18, 6 }
 0x11b   : > { %v6278_v26 = vadd.f32 %v4657_v40, %v863_v4  ;;  %v858_v6 = vadd.f32 %v857_v14, %v6134_v31  ;;  %v4660_v47 = vpop.f32.mrf.mxu0  ;;  %4977 = vmatmul.mubr.msk.f32.gmra.mxu0 %vm324_vm2, %v3300_v24  ;;  %v3306_v24 = vsel %vm3287_vm5, %v3303_v63, %v3305_v55  ;;  %v2874_v22 = vsel %vm2855_vm6, %v2871_v38, %v2873_v56 }
 0x11c   : > { %v4604_v21 = vpop.f32.mrf.mxu1  ;;  %4921 = vmatmul.mubr.msk.f32.gmra.mxu1 %vm324_vm2, %v2868_v17  ;;  %4979 = vmatprep.mubr.msk.f32.mxu0 %vm324_vm2, %v3302_v41  ;;  %v5073_v17 = vld [vmem:[%s5165_s22 + $0x78] sm:$0xff]  ;;  %v2876_v63 = vsel %vm2855_vm6, %v2873_v56, %v2875_v58 }
 0x11d   : > { %v6287_v40 = vadd.f32 %v1253_v1, %v858_v6  ;;  %v873_v31 = vadd.f32 %v4604_v21, %v6141_v57  ;;  %v1263_v25 = vpop.f32.mrf.mxu0  ;;  %4923 = vmatprep.mubr.msk.f32.mxu1 %vm324_vm2, %v2870_v28  ;;  %v3309_v4 = vrot.slane %v5073_v17, 6  ;;  %v2877_v37 = vrot.slane %v5073_v17, 5  ;;  %v5074_v6 = vld [vmem:[%s5165_s22 + $0x80] sm:$0xff] }
 0x11e   : > { %v867_v41 = vpop.f32.mrf.mxu1  ;;  %v3308_v28 = vsel %vm3287_vm5, %v3305_v55, %v3307_v34  ;;  %v2879_v38 = vrot.slane %v5074_v6, 5  ;;  %v3311_v21 = vrot.slane %v5074_v6, 6 }
 0x11f   : > { %v6294_v15 = vadd.f32 %v4660_v47, %v873_v31  ;;  %v868_v14 = vadd.f32 %v867_v41, %v6150_v33  ;;  %v4663_v1 = vpop.f32.mrf.mxu0  ;;  %4980 = vmatmul.mubr.msk.f32.gmra.mxu0 %vm324_vm2, %v3304_v60  ;;  %v3310_v60 = vsel %vm3287_vm5, %v3307_v34, %v3309_v4  ;;  %v5075_v31 = vld [vmem:[%s5165_s22 + $0x88] sm:$0xff] }
 0x120   : > { %v4607_v57 = vpop.f32.mrf.mxu1  ;;  %4924 = vmatmul.mubr.msk.f32.gmra.mxu1 %vm324_vm2, %v2872_v32  ;;  %4982 = vmatprep.mubr.msk.f32.mxu0 %vm324_vm2, %v3306_v24  ;;  %v3313_v32 = vrot.slane %v5075_v31, 6  ;;  %v2878_v24 = vsel %vm2855_vm6, %v2875_v58, %v2877_v37  ;;  %v2881_v56 = vrot.slane %v5075_v31, 5  ;;  %v3312_v34 = vsel %vm3287_vm5, %v3309_v4, %v3311_v21 }
 0x121   : > { %v6303_v47 = vadd.f32 %v1263_v25, %v868_v14  ;;  %v883_v33 = vadd.f32 %v4607_v57, %v5986_v19  ;;  %v1273_v18 = vpop.f32.mrf.mxu0  ;;  %4926 = vmatprep.mubr.msk.f32.mxu1 %vm324_vm2, %v2874_v22  ;;  %v2880_v19 = vsel %vm2855_vm6, %v2877_v37, %v2879_v38  ;;  %v2883_v22 = vrot.slane %v6008_v44, 5 }
 0x122   : > { %v877_v17 = vpop.f32.mrf.mxu1  ;;  %v3315_v58 = vrot.slane %v6008_v44, 6  ;;  %v3314_v57 = vsel %vm3287_vm5, %v3311_v21, %v3313_v32  ;;  %v2882_v37 = vsel %vm2855_vm6, %v2879_v38, %v2881_v56  ;;  %v2885_v4 = vrot.slane %v6016_v9, 5 }
 0x123   : > { %v6310_v41 = vadd.f32 %v4663_v1, %v883_v33  ;;  %v878_v55 = vadd.f32 %v877_v17, %v5997_v5  ;;  %v4666_v6 = vpop.f32.mrf.mxu0  ;;  %4983 = vmatmul.mubr.msk.f32.gmra.mxu0 %vm324_vm2, %v3308_v28  ;;  %v2884_v21 = vsel %vm2855_vm6, %v2881_v56, %v2883_v22  ;;  %v2887_v38 = vrot.slane %v6030_v27, 5 }
 0x124   : > { %v4610_v25 = vpop.f32.mrf.mxu1  ;;  %4927 = vmatmul.mubr.msk.f32.gmra.mxu1 %vm324_vm2, %v2876_v63  ;;  %4985 = vmatprep.mubr.msk.f32.mxu0 %vm324_vm2, %v3310_v60  ;;  %v3317_v63 = vrot.slane %v6016_v9, 6  ;;  %v3316_v60 = vsel %vm3287_vm5, %v3313_v32, %v3315_v58  ;;  %v3319_v9 = vrot.slane %v6030_v27, 6  ;;  %v2886_v56 = vsel %vm2855_vm6, %v2883_v22, %v2885_v4 }
 0x125   : > { %v6320_v14 = vadd.f32 %v1273_v18, %v878_v55  ;;  %v893_v5 = vadd.f32 %v4610_v25, %v6002_v8  ;;  %v1283_v1 = vpop.f32.mrf.mxu0  ;;  %4929 = vmatprep.mubr.msk.f32.mxu1 %vm324_vm2, %v2878_v24  ;;  %v3321_v55 = vrot.slane %v6038_v36, 6  ;;  %v2889_v32 = vrot.slane %v6038_v36, 5 }
 0x126   : > { %v887_v28 = vpop.f32.mrf.mxu1  ;;  %v3318_v24 = vsel %vm3287_vm5, %v3315_v58, %v3317_v63  ;;  %v3320_v58 = vsel %vm3287_vm5, %v3317_v63, %v3319_v9  ;;  %v2891_v22 = vrot.slane %v6052_v48, 5  ;;  %v3323_v36 = vrot.slane %v6052_v48, 6 }
 0x127   : > { %v6328_v33 = vadd.f32 %v4666_v6, %v893_v5  ;;  %v888_v44 = vadd.f32 %v887_v28, %v6019_v2  ;;  %v4669_v18 = vpop.f32.mrf.mxu0  ;;  %4986 = vmatmul.mubr.msk.f32.gmra.mxu0 %vm324_vm2, %v3312_v34  ;;  %v2888_v34 = vsel %vm2855_vm6, %v2885_v4, %v2887_v38  ;;  %v3325_v28 = vrot.slane %v6060_v29, 6 }
 0x128   : > { %v4613_v8 = vpop.f32.mrf.mxu1  ;;  %4930 = vmatmul.mubr.msk.f32.gmra.mxu1 %vm324_vm2, %v2880_v19  ;;  %4988 = vmatprep.mubr.msk.f32.mxu0 %vm324_vm2, %v3314_v57  ;;  %v3322_v57 = vsel %vm3287_vm5, %v3319_v9, %v3321_v55  ;;  %v2890_v4 = vsel %vm2855_vm6, %v2887_v38, %v2889_v32  ;;  %v2893_v63 = vrot.slane %v6060_v29, 5  ;;  %v3327_v29 = vrot.slane %v6074_v45, 6 }
 0x129   : > { %v6338_v31 = vadd.f32 %v1283_v1, %v888_v44  ;;  %v903_v2 = vadd.f32 %v4613_v8, %v6024_v13  ;;  %v1293_v17 = vpop.f32.mrf.mxu0  ;;  %4932 = vmatprep.mubr.msk.f32.mxu1 %vm324_vm2, %v2882_v37  ;;  %v2892_v8 = vsel %vm2855_vm6, %v2889_v32, %v2891_v22 }
 0x12a   : > { %v897_v6 = vpop.f32.mrf.mxu1 }
 0x12b   : > { %v6346_v25 = vadd.f32 %v4669_v18, %v903_v2  ;;  %v898_v27 = vadd.f32 %v897_v6, %v6041_v35  ;;  %v4672_v19 = vpop.f32.mrf.mxu0  ;;  %4989 = vmatmul.mubr.msk.f32.gmra.mxu0 %vm324_vm2, %v3316_v60  ;;  %v2895_v60 = vrot.slane %v6074_v45, 5  ;;  %v3326_v2 = vsel %vm3287_vm5, %v3323_v36, %v3325_v28 }
 0x12c   : > { %v4616_v13 = vpop.f32.mrf.mxu1  ;;  %4933 = vmatmul.mubr.msk.f32.gmra.mxu1 %vm324_vm2, %v2884_v21  ;;  %4991 = vmatprep.mubr.msk.f32.mxu0 %vm324_vm2, %v3318_v24  ;;  %v3324_v21 = vsel %vm3287_vm5, %v3321_v55, %v3323_v36  ;;  %v2894_v6 = vsel %vm2855_vm6, %v2891_v22, %v2893_v63  ;;  %v2897_v55 = vrot.slane %v6082_v10, 5  ;;  %v3333_v36 = vrot.slane %v6104_v39, 6 }
 0x12d   : > { %v6356_v5 = vadd.f32 %v1293_v17, %v898_v27  ;;  %v913_v35 = vadd.f32 %v4616_v13, %v6046_v7  ;;  %v1303_v1 = vpop.f32.mrf.mxu0  ;;  %4935 = vmatprep.mubr.msk.f32.mxu1 %vm324_vm2, %v2886_v56  ;;  %v3329_v17 = vrot.slane %v6082_v10, 6  ;;  %v2896_v27 = vsel %vm2855_vm6, %v2893_v63, %v2895_v60 }
 0x12e   : > { %v907_v37 = vpop.f32.mrf.mxu1  ;;  %v2899_v13 = vrot.slane %v6096_v12, 5  ;;  %v3331_v10 = vrot.slane %v6096_v12, 6 }
 0x12f   : > { %v6364_v44 = vadd.f32 %v4672_v19, %v913_v35  ;;  %v908_v48 = vadd.f32 %v907_v37, %v6063_v51  ;;  %v4675_v18 = vpop.f32.mrf.mxu0  ;;  %4992 = vmatmul.mubr.msk.f32.gmra.mxu0 %vm324_vm2, %v3320_v58  ;;  %v3328_v19 = vsel %vm3287_vm5, %v3325_v28, %v3327_v29  ;;  %v3330_v22 = vsel %vm3287_vm5, %v3327_v29, %v3329_v17 }
 0x130   : > { %v4619_v7 = vpop.f32.mrf.mxu1  ;;  %4936 = vmatmul.mubr.msk.f32.gmra.mxu1 %vm324_vm2, %v2888_v34  ;;  %4994 = vmatprep.mubr.msk.f32.mxu0 %vm324_vm2, %v3322_v57  ;;  %v2901_v57 = vrot.slane %v6104_v39, 5  ;;  %v3332_v63 = vsel %vm3287_vm5, %v3329_v17, %v3331_v10 }
 0x131   : > { %v6374_v38 = vadd.f32 %v1303_v1, %v908_v48  ;;  %v923_v51 = vadd.f32 %v4619_v7, %v6068_v59  ;;  %v1313_v9 = vpop.f32.mrf.mxu0  ;;  %4938 = vmatprep.mubr.msk.f32.mxu1 %vm324_vm2, %v2890_v4  ;;  %v2898_v1 = vsel %vm2855_vm6, %v2895_v60, %v2897_v55  ;;  %v2900_v4 = vsel %vm2855_vm6, %v2897_v55, %v2899_v13  ;;  %v5076_v48 = vld [vmem:[%s5165_s22 + $0xe0] sm:$0xff]  ;;  %v5077_v60 = vld [vmem:[%s5165_s22 + $0xe8] sm:$0xff] }
 0x132   : > { %v917_v24 = vpop.f32.mrf.mxu1  ;;  %v3335_v39 = vrot.slane %v5076_v48, 6  ;;  %v3337_v29 = vrot.slane %v5077_v60, 6 }
 0x133   : > { %v6382_v56 = vadd.f32 %v4675_v18, %v923_v51  ;;  %v918_v45 = vadd.f32 %v917_v24, %v6085_v23  ;;  %v4678_v32 = vpop.f32.mrf.mxu0  ;;  %4995 = vmatmul.mubr.msk.f32.gmra.mxu0 %vm324_vm2, %v3324_v21  ;;  %v2903_v18 = vrot.slane %v5076_v48, 5  ;;  %v3334_v21 = vsel %vm3287_vm5, %v3331_v10, %v3333_v36  ;;  %v6917_v24 = vld [vmem:[#allocation7_spill] sm:$0xff]  ;;  %v6918_v10 = vld [vmem:[#allocation8_spill] sm:$0xff] }
 0x134   : > { %v4622_v59 = vpop.f32.mrf.mxu1  ;;  %4939 = vmatmul.mubr.msk.f32.gmra.mxu1 %vm324_vm2, %v2892_v8  ;;  %4997 = vmatprep.mubr.msk.f32.mxu0 %vm324_vm2, %v3326_v2  ;;  %v2905_v2 = vrot.slane %v5077_v60, 5 }
 0x135   : > { %v6392_v34 = vadd.f32 %v1313_v9, %v918_v45  ;;  %v933_v23 = vadd.f32 %v4622_v59, %v6090_v61  ;;  %v1323_v58 = vpop.f32.mrf.mxu0  ;;  %4941 = vmatprep.mubr.msk.f32.mxu1 %vm324_vm2, %v2894_v6  ;;  %v2902_v9 = vsel %vm2855_vm6, %v2899_v13, %v2901_v57  ;;  %v2904_v45 = vsel %vm2855_vm6, %v2901_v57, %v2903_v18  ;;  %v5078_v59 = vld [vmem:[%s5165_s22 + $0xf0] sm:$0xff] }
 0x136   : > { %v927_v35 = vpop.f32.mrf.mxu1  ;;  %v2906_v57 = vsel %vm2855_vm6, %v2903_v18, %v2905_v2 }
 0x137   : > { %v6400_v28 = vadd.f32 %v4678_v32, %v933_v23  ;;  %v928_v12 = vadd.f32 %v927_v35, %v6107_v52  ;;  %v4681_v37 = vpop.f32.mrf.mxu0  ;;  %4998 = vmatmul.mubr.msk.f32.gmra.mxu0 %vm324_vm2, %v3328_v19  ;;  %v3336_v32 = vsel %vm3287_vm5, %v3333_v36, %v3335_v39  ;;  %v3339_v19 = vrot.slane %v5078_v59, 6  ;;  %v5079_v35 = vld [vmem:[%s5165_s22 + $0xf8] sm:$0xff] }
 0x138   : > { %v4625_v61 = vpop.f32.mrf.mxu1  ;;  %4942 = vmatmul.mubr.msk.f32.gmra.mxu1 %vm324_vm2, %v2896_v27  ;;  %5000 = vmatprep.mubr.msk.f32.mxu0 %vm324_vm2, %v3330_v22  ;;  %v2907_v27 = vrot.slane %v5078_v59, 5  ;;  %v3338_v22 = vsel %vm3287_vm5, %v3335_v39, %v3337_v29  ;;  %v6921_v59 = vld [vmem:[#allocation11_spill] sm:$0xff] }
 0x139   : > { %v6409_v7 = vadd.f32 %v1323_v58, %v928_v12  ;;  %v943_v52 = vadd.f32 %v4625_v61, %v6112_v11  ;;  %v1333_v8 = vpop.f32.mrf.mxu0  ;;  %4944 = vmatprep.mubr.msk.f32.mxu1 %vm324_vm2, %v2898_v1  ;;  %v3341_v1 = vrot.slane %v5079_v35, 6  ;;  %v6919_v61 = vld [vmem:[#allocation9_spill] sm:$0xff] }
 0x13a   : > { %v937_v51 = vpop.f32.mrf.mxu1  ;;  %v2908_v39 = vsel %vm2855_vm6, %v2905_v2, %v2907_v27 }
 0x13b   : > { %v6416_v17 = vadd.f32 %v4681_v37, %v943_v52  ;;  %v938_v6 = vadd.f32 %v937_v51, %v6917_v24  ;;  %v4684_v55 = vpop.f32.mrf.mxu0  ;;  %5001 = vmatmul.mubr.msk.f32.gmra.mxu0 %vm324_vm2, %v3332_v63  ;;  %v2909_v37 = vrot.slane %v5079_v35, 5  ;;  %v3340_v52 = vsel %vm3287_vm5, %v3337_v29, %v3339_v19  ;;  %v6920_v51 = vld [vmem:[#allocation10_spill] sm:$0xff]  ;;  %v5082_v35 = vld [vmem:[%s5165_s22 + $0x110] sm:$0xff] }
 0x13c   : > { %v4628_v11 = vpop.f32.mrf.mxu1  ;;  %4945 = vmatmul.mubr.msk.f32.gmra.mxu1 %vm324_vm2, %v2900_v4  ;;  %5003 = vmatprep.mubr.msk.f32.mxu0 %vm324_vm2, %v3334_v21 }
 0x13d   : > { %v6425_v13 = vadd.f32 %v1333_v8, %v938_v6  ;;  %v953_v23 = vadd.f32 %v4628_v11, %v6918_v10  ;;  %v1343_v58 = vpop.f32.mrf.mxu0  ;;  %4947 = vmatprep.mubr.msk.f32.mxu1 %vm324_vm2, %v2902_v9  ;;  %v5080_v8 = vld [vmem:[%s5165_s22 + $0x100] sm:$0xff]  ;;  %v3342_v6 = vsel %vm3287_vm5, %v3339_v19, %v3341_v1  ;;  %v2910_v2 = vsel %vm2855_vm6, %v2907_v27, %v2909_v37 }
 0x13e   : > { %v947_v12 = vpop.f32.mrf.mxu1  ;;  %v2911_v18 = vrot.slane %v5080_v8, 5  ;;  %v3343_v21 = vrot.slane %v5080_v8, 6  ;;  %v2915_v27 = vrot.slane %v5082_v35, 5 }
 0x13f   : > { %v6432_v36 = vadd.f32 %v4684_v55, %v953_v23  ;;  %v948_v4 = vadd.f32 %v947_v12, %v6919_v61  ;;  %v4687_v63 = vpop.f32.mrf.mxu0  ;;  %5004 = vmatmul.mubr.msk.f32.gmra.mxu0 %vm324_vm2, %v3336_v32  ;;  %v5081_v55 = vld [vmem:[%s5165_s22 + $0x108] sm:$0xff]  ;;  %v3347_v12 = vrot.slane %v5082_v35, 6 }
 0x140   : > { %v4631_v48 = vpop.f32.mrf.mxu1  ;;  %4948 = vmatmul.mubr.msk.f32.gmra.mxu1 %vm324_vm2, %v2904_v45  ;;  %5006 = vmatprep.mubr.msk.f32.mxu0 %vm324_vm2, %v3338_v22  ;;  %v3345_v11 = vrot.slane %v5081_v55, 6  ;;  %v2913_v32 = vrot.slane %v5081_v55, 5  ;;  %v2912_v19 = vsel %vm2855_vm6, %v2909_v37, %v2911_v18  ;;  %v3344_v22 = vsel %vm3287_vm5, %v3341_v1, %v3343_v21 }
 0x141   : > { %v6441_v60 = vadd.f32 %v1343_v58, %v948_v4  ;;  %v963_v9 = vadd.f32 %v4631_v48, %v6920_v51  ;;  %v1353_v24 = vpop.f32.mrf.mxu0  ;;  %4950 = vmatprep.mubr.msk.f32.mxu1 %vm324_vm2, %v2906_v57  ;;  %v5083_v48 = vld [vmem:[%s5165_s22 + $0x118] sm:$0xff] }
 0x142   : > { %v957_v45 = vpop.f32.mrf.mxu1  ;;  %v2914_v37 = vsel %vm2855_vm6, %v2911_v18, %v2913_v32  ;;  %v2917_v8 = vrot.slane %v5083_v48, 5 }
 0x143   : > { %v6448_v29 = vadd.f32 %v4687_v63, %v963_v9  ;;  %v958_v10 = vadd.f32 %v957_v45, %v6921_v59  ;;  %v4748_v23 = vpop.f32.mrf.mxu0  ;;  %5007 = vmatmul.mubr.msk.f32.gmra.mxu0 %vm324_vm2, %v3340_v52  ;;  %v3346_v63 = vsel %vm3287_vm5, %v3343_v21, %v3345_v11  ;;  %v2916_v21 = vsel %vm2855_vm6, %v2913_v32, %v2915_v27 }
 0x144   : > { %v4692_v58 = vpop.f32.mrf.mxu1  ;;  %4951 = vmatmul.mubr.msk.f32.gmra.mxu1 %vm324_vm2, %v2908_v39  ;;  %5009 = vmatprep.mubr.msk.f32.mxu0 %vm324_vm2, %v3342_v6  ;;  %v3349_v39 = vrot.slane %v5083_v48, 6  ;;  %v5084_v6 = vld [vmem:[%s5165_s22 + $0x120] sm:$0xff]  ;;  %v2918_v32 = vsel %vm2855_vm6, %v2915_v27, %v2917_v8 }
 0x145   : > { %v6457_v57 = vadd.f32 %v1353_v24, %v958_v10  ;;  %v1659_v61 = vadd.f32 %v4692_v58, %v6166_v46  ;;  %v1911_v4 = vpop.f32.mrf.mxu0  ;;  %4953 = vmatprep.mubr.msk.f32.mxu1 %vm324_vm2, %v2910_v2  ;;  %v3348_v24 = vsel %vm3287_vm5, %v3345_v11, %v3347_v12  ;;  %v2919_v18 = vrot.slane %v5084_v6, 5  ;;  %v5085_v10 = vld [vmem:[%s5165_s22 + $0x128] sm:$0xff] }
 0x146   : > { %v1479_v52 = vpop.f32.mrf.mxu1  ;;  %v3351_v55 = vrot.slane %v5084_v6, 6  ;;  %v3350_v59 = vsel %vm3287_vm5, %v3347_v12, %v3349_v39 }
 0x147   : > { %v6464_v1 = vadd.f32 %v4748_v23, %v1659_v61  ;;  %v1658_v51 = vadd.f32 %v1479_v52, %v6174_v62  ;;  %v4751_v9 = vpop.f32.mrf.mxu0  ;;  %5010 = vmatmul.mubr.msk.f32.gmra.mxu0 %vm324_vm2, %v3344_v22  ;;  %v3353_v23 = vrot.slane %v5085_v10, 6  ;;  %v2920_v12 = vsel %vm2855_vm6, %v2917_v8, %v2919_v18 }
 0x148   : > { %v4695_v46 = vpop.f32.mrf.mxu1  ;;  %4954 = vmatmul.mubr.msk.f32.gmra.mxu1 %vm324_vm2, %v2912_v19  ;;  %5012 = vmatprep.mubr.msk.f32.mxu0 %vm324_vm2, %v3346_v63  ;;  %v2921_v19 = vrot.slane %v5085_v10, 5  ;;  %v3352_v61 = vsel %vm3287_vm5, %v3349_v39, %v3351_v55  ;;  %v6924_v10 = vld [vmem:[#allocation14_spill] sm:$0xff] }
 0x149   : > { %v6473_v45 = vadd.f32 %v1911_v4, %v1658_v51  ;;  %v1661_v62 = vadd.f32 %v4695_v46, %v6183_v16  ;;  %v1921_v2 = vpop.f32.mrf.mxu0  ;;  %4956 = vmatprep.mubr.msk.f32.mxu1 %vm324_vm2, %v2914_v37  ;;  %v5086_v4 = vld [vmem:[%s5165_s22 + $0x130] sm:$0xff]  ;;  %v3354_v37 = vsel %vm3287_vm5, %v3351_v55, %v3353_v23 }
 0x14a   : > { %v1489_v58 = vpop.f32.mrf.mxu1  ;;  %v2923_v63 = vrot.slane %v5086_v4, 5  ;;  %v3355_v27 = vrot.slane %v5086_v4, 6  ;;  %v6922_v51 = vld [vmem:[#allocation12_spill] sm:$0xff] }
 0x14b   : > { %v6480_v11 = vadd.f32 %v4751_v9, %v1661_v62  ;;  %v1660_v22 = vadd.f32 %v1489_v58, %v6192_v42  ;;  %v4754_v35 = vpop.f32.mrf.mxu0  ;;  %5013 = vmatmul.mubr.msk.f32.gmra.mxu0 %vm324_vm2, %v3348_v24  ;;  %v3357_v9 = vrot.slane %v6922_v51, 6  ;;  %v2925_v8 = vrot.slane %v6922_v51, 5 }
 0x14c   : > { %v4698_v16 = vpop.f32.mrf.mxu1  ;;  %4957 = vmatmul.mubr.msk.f32.gmra.mxu1 %vm324_vm2, %v2916_v21  ;;  %5015 = vmatprep.mubr.msk.f32.mxu0 %vm324_vm2, %v3350_v59  ;;  %v2922_v21 = vsel %vm2855_vm6, %v2919_v18, %v2921_v19  ;;  %v2924_v55 = vsel %vm2855_vm6, %v2921_v19, %v2923_v63  ;;  %v3356_v62 = vsel %vm3287_vm5, %v3353_v23, %v3355_v27 }
 0x14d   : > { %v6489_v48 = vadd.f32 %v1921_v2, %v1660_v22  ;;  %v1663_v52 = vadd.f32 %v4698_v16, %v6200_v43  ;;  %v1931_v42 = vpop.f32.mrf.mxu0  ;;  %4959 = vmatprep.mubr.msk.f32.mxu1 %vm324_vm2, %v2918_v32  ;;  %v6923_v2 = vld [vmem:[#allocation13_spill] sm:$0xff]  ;;  %v2926_v16 = vsel %vm2855_vm6, %v2923_v63, %v2925_v8 }
 0x14e   : > { %v1499_v46 = vpop.f32.mrf.mxu1  ;;  %v3359_v18 = vrot.slane %v6923_v2, 6  ;;  %v2927_v22 = vrot.slane %v6923_v2, 5 }
 0x14f   : > { %v6497_v39 = vadd.f32 %v4754_v35, %v1663_v52  ;;  %v1662_v24 = vadd.f32 %v1499_v46, %v6209_v49  ;;  %v4757_v6 = vpop.f32.mrf.mxu0  ;;  %5016 = vmatmul.mubr.msk.f32.gmra.mxu0 %vm324_vm2, %v3352_v61  ;;  %v3358_v49 = vsel %vm3287_vm5, %v3355_v27, %v3357_v9 }
 0x150   : > { %v4701_v43 = vpop.f32.mrf.mxu1  ;;  %4960 = vmatmul.mubr.msk.f32.gmra.mxu1 %vm324_vm2, %v2920_v12  ;;  %5018 = vmatprep.mubr.msk.f32.mxu0 %vm324_vm2, %v3354_v37  ;;  %v3360_v4 = vsel %vm3287_vm5, %v3357_v9, %v3359_v18  ;;  %v2928_v63 = vsel %vm2855_vm6, %v2925_v8, %v2927_v22 }
 0x151   : > { %v6506_v59 = vadd.f32 %v1931_v42, %v1662_v24  ;;  %v1665_v58 = vadd.f32 %v4701_v43, %v6924_v10  ;;  %v1941_v32 = vpop.f32.mrf.mxu0  ;;  %4962 = vmatprep.mubr.msk.f32.mxu1 %vm324_vm2, %v2922_v21 }
 0x152   : > { %v1509_v35 = vpop.f32.mrf.mxu1 }
 0x153   : > { %v6513_v12 = vadd.f32 %v4757_v6, %v1665_v58  ;;  %v1664_v23 = vadd.f32 %v1509_v35, %v6223_v54  ;;  %v4760_v19 = vpop.f32.mrf.mxu0  ;;  %5019 = vmatmul.mubr.msk.f32.gmra.mxu0 %vm324_vm2, %v3356_v62 }
 0x154   : > { %v4704_v61 = vpop.f32.mrf.mxu1  ;;  %4963 = vmatmul.mubr.msk.f32.gmra.mxu1 %vm324_vm2, %v2924_v55  ;;  %5021 = vmatprep.mubr.msk.f32.mxu0 %vm324_vm2, %v3358_v49 }
 0x155   : > { %v6520_v27 = vadd.f32 %v1941_v32, %v1664_v23  ;;  %v1667_v52 = vadd.f32 %v4704_v61, %v6230_v20  ;;  %v1951_v42 = vpop.f32.mrf.mxu0  ;;  %4965 = vmatprep.mubr.msk.f32.mxu1 %vm324_vm2, %v2926_v16 }
 0x156   : > { %v1519_v54 = vpop.f32.mrf.mxu1 }
 0x157   : > { %v6525_v37 = vadd.f32 %v4760_v19, %v1667_v52  ;;  %v1666_v51 = vadd.f32 %v1519_v54, %v6239_v30  ;;  %v4763_v46 = vpop.f32.mrf.mxu0  ;;  %5022 = vmatmul.mubr.msk.f32.gmra.mxu0 %vm324_vm2, %v3360_v4 }
 0x158   : > { %v4707_v21 = vpop.f32.mrf.mxu1  ;;  %4966 = vmatmul.mubr.msk.f32.gmra.mxu1 %vm324_vm2, %v2928_v63 }
 0x159   : > { %v6530_v9 = vadd.f32 %v1951_v42, %v1666_v51  ;;  %v1669_v20 = vadd.f32 %v4707_v21, %v6246_v53  ;;  %v1961_v24 = vpop.f32.mrf.mxu0 }
 0x15a   : > { %v1529_v6 = vpop.f32.mrf.mxu1 }
 0x15b   : > { %v6533_v43 = vadd.f32 %v4763_v46, %v1669_v20  ;;  %v1668_v8 = vadd.f32 %v1529_v6, %v6255_v0  ;;  %v4766_v55 = vpop.f32.mrf.mxu0 }
 0x15c   : > { %v4710_v62 = vpop.f32.mrf.mxu1 }
 0x15d   : > { %v6536_v2 = vadd.f32 %v1961_v24, %v1668_v8  ;;  %v1671_v30 = vadd.f32 %v4710_v62, %v6262_v3  ;;  %v1971_v18 = vpop.f32.mrf.mxu0 }
 0x15e   : > { %v1539_v10 = vpop.f32.mrf.mxu1 }
 0x15f   : > { %v6539_v58 = vadd.f32 %v4766_v55, %v1671_v30  ;;  %v1670_v32 = vadd.f32 %v1539_v10, %v6271_v50  ;;  %v4769_v49 = vpop.f32.mrf.mxu0 }
 0x160   : > { %v4713_v53 = vpop.f32.mrf.mxu1 }
 0x161   : > { %v6542_v22 = vadd.f32 %v1971_v18, %v1670_v32  ;;  %v1673_v35 = vadd.f32 %v4713_v53, %v6278_v26  ;;  %v1981_v16 = vpop.f32.mrf.mxu0 }
 0x162   : > { %v1549_v0 = vpop.f32.mrf.mxu1 }
 0x163   : > { %v6545_v23 = vadd.f32 %v4769_v49, %v1673_v35  ;;  %v1672_v19 = vadd.f32 %v1549_v0, %v6287_v40  ;;  %v4772_v61 = vpop.f32.mrf.mxu0 }
 0x164   : > { %v4716_v3 = vpop.f32.mrf.mxu1 }
 0x165   : > { %v6548_v4 = vadd.f32 %v1981_v16, %v1672_v19  ;;  %v1675_v52 = vadd.f32 %v4716_v3, %v6294_v15  ;;  %v1991_v42 = vpop.f32.mrf.mxu0 }
 0x166   : > { %v1559_v50 = vpop.f32.mrf.mxu1 }
 0x167   : > { %v6551_v63 = vadd.f32 %v4772_v61, %v1675_v52  ;;  %v1674_v54 = vadd.f32 %v1559_v50, %v6303_v47  ;;  %v4775_v51 = vpop.f32.mrf.mxu0 }
 0x168   : > { %v4719_v26 = vpop.f32.mrf.mxu1 }
 0x169   : > { %v6554_v46 = vadd.f32 %v1991_v42, %v1674_v54  ;;  %v1677_v21 = vadd.f32 %v4719_v26, %v6310_v41  ;;  %v2001_v20 = vpop.f32.mrf.mxu0 }
 0x16a   : > { %v1569_v40 = vpop.f32.mrf.mxu1 }
 0x16b   : > { %v6557_v24 = vadd.f32 %v4775_v51, %v1677_v21  ;;  %v1676_v6 = vadd.f32 %v1569_v40, %v6320_v14  ;;  %v4778_v8 = vpop.f32.mrf.mxu0 }
 0x16c   : > { %v4722_v15 = vpop.f32.mrf.mxu1 }
 0x16d   : > { %v6560_v55 = vadd.f32 %v2001_v20, %v1676_v6  ;;  %v1679_v62 = vadd.f32 %v4722_v15, %v6328_v33  ;;  %v2011_v30 = vpop.f32.mrf.mxu0 }
 0x16e   : > { %v1579_v47 = vpop.f32.mrf.mxu1 }
 0x16f   : > { %v6563_v18 = vadd.f32 %v4778_v8, %v1679_v62  ;;  %v1678_v10 = vadd.f32 %v1579_v47, %v6338_v31  ;;  %v4781_v32 = vpop.f32.mrf.mxu0 }
 0x170   : > { %v4725_v41 = vpop.f32.mrf.mxu1 }
 0x171   : > { %v6566_v49 = vadd.f32 %v2011_v30, %v1678_v10  ;;  %v1681_v53 = vadd.f32 %v4725_v41, %v6346_v25  ;;  %v2021_v35 = vpop.f32.mrf.mxu0 }
 0x172   : > { %v1589_v14 = vpop.f32.mrf.mxu1 }
 0x173   : > { %v6569_v16 = vadd.f32 %v4781_v32, %v1681_v53  ;;  %v1680_v0 = vadd.f32 %v1589_v14, %v6356_v5  ;;  %v4784_v19 = vpop.f32.mrf.mxu0 }
 0x174   : > { %v4728_v33 = vpop.f32.mrf.mxu1 }
 0x175   : > { %v6572_v61 = vadd.f32 %v2021_v35, %v1680_v0  ;;  %v1683_v3 = vadd.f32 %v4728_v33, %v6364_v44  ;;  %v2031_v52 = vpop.f32.mrf.mxu0 }
 0x176   : > { %v1599_v31 = vpop.f32.mrf.mxu1 }
 0x177   : > { %v6575_v42 = vadd.f32 %v4784_v19, %v1683_v3  ;;  %v1682_v50 = vadd.f32 %v1599_v31, %v6374_v38  ;;  %v4787_v54 = vpop.f32.mrf.mxu0 }
 0x178   : > { %v4731_v25 = vpop.f32.mrf.mxu1 }
 0x179   : > { %v6578_v51 = vadd.f32 %v2031_v52, %v1682_v50  ;;  %v1685_v26 = vadd.f32 %v4731_v25, %v6382_v56  ;;  %v2041_v21 = vpop.f32.mrf.mxu0 }
 0x17a   : > { %v1609_v5 = vpop.f32.mrf.mxu1 }
 0x17b   : > { %v6581_v20 = vadd.f32 %v4787_v54, %v1685_v26  ;;  %v1684_v40 = vadd.f32 %v1609_v5, %v6392_v34  ;;  %v4790_v6 = vpop.f32.mrf.mxu0 }
 0x17c   : > { %v4734_v44 = vpop.f32.mrf.mxu1 }
 0x17d   : > { %v6584_v8 = vadd.f32 %v2041_v21, %v1684_v40  ;;  %v1687_v15 = vadd.f32 %v4734_v44, %v6400_v28  ;;  %v2051_v62 = vpop.f32.mrf.mxu0 }
 0x17e   : > { %v1619_v38 = vpop.f32.mrf.mxu1 }
 0x17f   : > { %v6587_v30 = vadd.f32 %v4790_v6, %v1687_v15  ;;  %v1686_v47 = vadd.f32 %v1619_v38, %v6409_v7  ;;  %v4793_v10 = vpop.f32.mrf.mxu0 }
 0x180   : > { %v4737_v56 = vpop.f32.mrf.mxu1 }
 0x181   : > { %v6590_v32 = vadd.f32 %v2051_v62, %v1686_v47  ;;  %v1689_v41 = vadd.f32 %v4737_v56, %v6416_v17  ;;  %v2061_v53 = vpop.f32.mrf.mxu0 }
 0x182   : > { %v1629_v34 = vpop.f32.mrf.mxu1 }
 0x183   : > { %v6593_v35 = vadd.f32 %v4793_v10, %v1689_v41  ;;  %v1688_v14 = vadd.f32 %v1629_v34, %v6425_v13  ;;  %v4796_v0 = vpop.f32.mrf.mxu0 }
 0x184   : > { %v4740_v28 = vpop.f32.mrf.mxu1 }
 0x185   : > { %v6596_v19 = vadd.f32 %v2061_v53, %v1688_v14  ;;  %v1691_v33 = vadd.f32 %v4740_v28, %v6432_v36  ;;  %v2071_v3 = vpop.f32.mrf.mxu0 }
 0x186   : > { %v1639_v7 = vpop.f32.mrf.mxu1 }
 0x187   : > { %v6599_v52 = vadd.f32 %v4796_v0, %v1691_v33  ;;  %v1690_v31 = vadd.f32 %v1639_v7, %v6441_v60  ;;  %v4799_v50 = vpop.f32.mrf.mxu0 }
 0x188   : > { %v4743_v17 = vpop.f32.mrf.mxu1 }
 0x189   : > { %v6602_v54 = vadd.f32 %v2071_v3, %v1690_v31  ;;  %v1693_v25 = vadd.f32 %v4743_v17, %v6448_v29  ;;  %v2081_v26 = vpop.f32.mrf.mxu0 }
 0x18a   : > { %v1649_v13 = vpop.f32.mrf.mxu1 }
 0x18b   : > { %v6605_v21 = vadd.f32 %v4799_v50, %v1693_v25  ;;  %v1692_v5 = vadd.f32 %v1649_v13, %v6457_v57  ;;  %v4860_v40 = vpop.f32.mrf.mxu0 }
 0x18c   : > { %v4804_v36 = vpop.f32.mrf.mxu1 }
 0x18d   : > { %v6608_v6 = vadd.f32 %v2081_v26, %v1692_v5  ;;  %v2522_v44 = vadd.f32 %v4804_v36, %v6464_v1  ;;  %v2638_v15 = vpop.f32.mrf.mxu0 }
 0x18e   : > { %v2342_v60 = vpop.f32.mrf.mxu1 }
 0x18f   : > { %v6611_v62 = vadd.f32 %v4860_v40, %v2522_v44  ;;  %v2521_v38 = vadd.f32 %v2342_v60, %v6473_v45  ;;  %v4863_v47 = vpop.f32.mrf.mxu0 }
 0x190   : > { %v4807_v29 = vpop.f32.mrf.mxu1 }
 0x191   : > { %v6614_v10 = vadd.f32 %v2638_v15, %v2521_v38  ;;  %v2524_v56 = vadd.f32 %v4807_v29, %v6480_v11  ;;  %v2648_v41 = vpop.f32.mrf.mxu0 }
 0x192   : > { %v2352_v57 = vpop.f32.mrf.mxu1 }
 0x193   : > { %v6617_v53 = vadd.f32 %v4863_v47, %v2524_v56  ;;  %v2523_v34 = vadd.f32 %v2352_v57, %v6489_v48  ;;  %v4866_v14 = vpop.f32.mrf.mxu0 }
 0x194   : > { %v4810_v1 = vpop.f32.mrf.mxu1 }
 0x195   : > { %v6620_v0 = vadd.f32 %v2648_v41, %v2523_v34  ;;  %v2526_v28 = vadd.f32 %v4810_v1, %v6497_v39  ;;  %v2658_v33 = vpop.f32.mrf.mxu0 }
 0x196   : > { %v2362_v45 = vpop.f32.mrf.mxu1 }
 0x197   : > { %v6623_v3 = vadd.f32 %v4866_v14, %v2526_v28  ;;  %v2525_v7 = vadd.f32 %v2362_v45, %v6506_v59  ;;  %v4869_v31 = vpop.f32.mrf.mxu0 }
 0x198   : > { %v4813_v11 = vpop.f32.mrf.mxu1 }
 0x199   : > { %v6626_v50 = vadd.f32 %v2658_v33, %v2525_v7  ;;  %v2528_v17 = vadd.f32 %v4813_v11, %v6513_v12  ;;  %v2668_v25 = vpop.f32.mrf.mxu0 }
 0x19a   : > { %v2372_v48 = vpop.f32.mrf.mxu1 }
 0x19b   : > { %v6629_v26 = vadd.f32 %v4869_v31, %v2528_v17  ;;  %v2527_v13 = vadd.f32 %v2372_v48, %v6520_v27  ;;  %v4872_v5 = vpop.f32.mrf.mxu0 }
 0x19c   : > { %v4816_v39 = vpop.f32.mrf.mxu1 }
 0x19d   : > { %v6632_v40 = vadd.f32 %v2668_v25, %v2527_v13  ;;  %v2530_v36 = vadd.f32 %v4816_v39, %v6525_v37  ;;  %v2678_v44 = vpop.f32.mrf.mxu0 }
 0x19e   : > { %v2382_v59 = vpop.f32.mrf.mxu1 }
 0x19f   : > { %v6635_v15 = vadd.f32 %v4872_v5, %v2530_v36  ;;  %v2529_v60 = vadd.f32 %v2382_v59, %v6530_v9  ;;  %v4875_v38 = vpop.f32.mrf.mxu0 }
 0x1a0   : > { %v4819_v12 = vpop.f32.mrf.mxu1 }
 0x1a1   : > { %v6638_v47 = vadd.f32 %v2678_v44, %v2529_v60  ;;  %v2532_v29 = vadd.f32 %v4819_v12, %v6533_v43  ;;  %v2688_v56 = vpop.f32.mrf.mxu0 }
 0x1a2   : > { %v2392_v27 = vpop.f32.mrf.mxu1 }
 0x1a3   : > { %v6641_v41 = vadd.f32 %v4875_v38, %v2532_v29  ;;  %v2531_v57 = vadd.f32 %v2392_v27, %v6536_v2  ;;  %v4878_v34 = vpop.f32.mrf.mxu0 }
 0x1a4   : > { %v4822_v37 = vpop.f32.mrf.mxu1 }
 0x1a5   : > { %v6644_v14 = vadd.f32 %v2688_v56, %v2531_v57  ;;  %v2534_v1 = vadd.f32 %v4822_v37, %v6539_v58  ;;  %v2698_v28 = vpop.f32.mrf.mxu0 }
 0x1a6   : > { %v2402_v9 = vpop.f32.mrf.mxu1 }
 0x1a7   : > { %v6647_v33 = vadd.f32 %v4878_v34, %v2534_v1  ;;  %v2533_v45 = vadd.f32 %v2402_v9, %v6542_v22  ;;  %v4881_v7 = vpop.f32.mrf.mxu0 }
 0x1a8   : > { %v4825_v43 = vpop.f32.mrf.mxu1 }
 0x1a9   : > { %v6650_v31 = vadd.f32 %v2698_v28, %v2533_v45  ;;  %v2536_v11 = vadd.f32 %v4825_v43, %v6545_v23  ;;  %v2708_v17 = vpop.f32.mrf.mxu0 }
 0x1aa   : > { %v2412_v2 = vpop.f32.mrf.mxu1 }
 0x1ab   : > { %v6653_v25 = vadd.f32 %v4881_v7, %v2536_v11  ;;  %v2535_v48 = vadd.f32 %v2412_v2, %v6548_v4  ;;  %v4884_v13 = vpop.f32.mrf.mxu0 }
 0x1ac   : > { %v4828_v58 = vpop.f32.mrf.mxu1 }
 0x1ad   : > { %v6656_v5 = vadd.f32 %v2708_v17, %v2535_v48  ;;  %v2538_v39 = vadd.f32 %v4828_v58, %v6551_v63  ;;  %v2718_v36 = vpop.f32.mrf.mxu0 }
 0x1ae   : > { %v2422_v22 = vpop.f32.mrf.mxu1 }
 0x1af   : > { %v6659_v44 = vadd.f32 %v4884_v13, %v2538_v39  ;;  %v2537_v59 = vadd.f32 %v2422_v22, %v6554_v46  ;;  %v4887_v60 = vpop.f32.mrf.mxu0 }
 0x1b0   : > { %v4831_v23 = vpop.f32.mrf.mxu1 }
 0x1b1   : > { %v6662_v38 = vadd.f32 %v2718_v36, %v2537_v59  ;;  %v2540_v12 = vadd.f32 %v4831_v23, %v6557_v24  ;;  %v2728_v29 = vpop.f32.mrf.mxu0 }
 0x1b2   : > { %v2432_v4 = vpop.f32.mrf.mxu1 }
 0x1b3   : > { %v6665_v56 = vadd.f32 %v4887_v60, %v2540_v12  ;;  %v2539_v27 = vadd.f32 %v2432_v4, %v6560_v55  ;;  %v4890_v57 = vpop.f32.mrf.mxu0 }
 0x1b4   : > { %v4834_v63 = vpop.f32.mrf.mxu1 }
 0x1b5   : > { %v6668_v34 = vadd.f32 %v2728_v29, %v2539_v27  ;;  %v2542_v37 = vadd.f32 %v4834_v63, %v6563_v18  ;;  %v2738_v1 = vpop.f32.mrf.mxu0 }
 0x1b6   : > { %v2442_v46 = vpop.f32.mrf.mxu1 }
 0x1b7   : > { %v6671_v28 = vadd.f32 %v4890_v57, %v2542_v37  ;;  %v2541_v9 = vadd.f32 %v2442_v46, %v6566_v49  ;;  %v4893_v45 = vpop.f32.mrf.mxu0 }
 0x1b8   : > { %v4837_v24 = vpop.f32.mrf.mxu1 }
 0x1b9   : > { %v6674_v7 = vadd.f32 %v2738_v1, %v2541_v9  ;;  %v2544_v43 = vadd.f32 %v4837_v24, %v6569_v16  ;;  %v2748_v11 = vpop.f32.mrf.mxu0 }
 0x1ba   : > { %v2452_v55 = vpop.f32.mrf.mxu1 }
 0x1bb   : > { %v6677_v17 = vadd.f32 %v4893_v45, %v2544_v43  ;;  %v2543_v2 = vadd.f32 %v2452_v55, %v6572_v61  ;;  %v4896_v48 = vpop.f32.mrf.mxu0 }
 0x1bc   : > { %v4840_v18 = vpop.f32.mrf.mxu1 }
 0x1bd   : > { %v6680_v13 = vadd.f32 %v2748_v11, %v2543_v2  ;;  %v2546_v58 = vadd.f32 %v4840_v18, %v6575_v42  ;;  %v2758_v39 = vpop.f32.mrf.mxu0 }
 0x1be   : > { %v2462_v49 = vpop.f32.mrf.mxu1 }
 0x1bf   : > { %v6683_v36 = vadd.f32 %v4896_v48, %v2546_v58  ;;  %v2545_v22 = vadd.f32 %v2462_v49, %v6578_v51  ;;  %v4899_v59 = vpop.f32.mrf.mxu0 }
 0x1c0   : > { %v4843_v16 = vpop.f32.mrf.mxu1 }
 0x1c1   : > { %v6686_v60 = vadd.f32 %v2758_v39, %v2545_v22  ;;  %v2548_v23 = vadd.f32 %v4843_v16, %v6581_v20  ;;  %v2768_v12 = vpop.f32.mrf.mxu0 }
 0x1c2   : > { %v2472_v61 = vpop.f32.mrf.mxu1 }
 0x1c3   : > { %v6689_v29 = vadd.f32 %v4899_v59, %v2548_v23  ;;  %v2547_v4 = vadd.f32 %v2472_v61, %v6584_v8  ;;  %v4902_v27 = vpop.f32.mrf.mxu0 }
 0x1c4   : > { %v4846_v42 = vpop.f32.mrf.mxu1 }
 0x1c5   : > { %v6692_v57 = vadd.f32 %v2768_v12, %v2547_v4  ;;  %v2550_v63 = vadd.f32 %v4846_v42, %v6587_v30  ;;  %v2778_v37 = vpop.f32.mrf.mxu0 }
 0x1c6   : > { %v2482_v51 = vpop.f32.mrf.mxu1 }
 0x1c7   : > { %v6695_v1 = vadd.f32 %v4902_v27, %v2550_v63  ;;  %v2549_v46 = vadd.f32 %v2482_v51, %v6590_v32  ;;  %v4905_v9 = vpop.f32.mrf.mxu0 }
 0x1c8   : > { %v4849_v20 = vpop.f32.mrf.mxu1 }
 0x1c9   : > { %v6698_v45 = vadd.f32 %v2778_v37, %v2549_v46  ;;  %v2552_v24 = vadd.f32 %v4849_v20, %v6593_v35  ;;  %v2788_v43 = vpop.f32.mrf.mxu0 }
 0x1ca   : > { %v2492_v8 = vpop.f32.mrf.mxu1 }
 0x1cb   : > { %v6701_v11 = vadd.f32 %v4905_v9, %v2552_v24  ;;  %v2551_v55 = vadd.f32 %v2492_v8, %v6596_v19  ;;  %v4908_v30 = vpop.f32.mrf.mxu0 }
 0x1cc   : > { %v4852_v2 = vpop.f32.mrf.mxu1 }
 0x1cd   : > { %v6704_v48 = vadd.f32 %v2788_v43, %v2551_v55  ;;  %v2554_v18 = vadd.f32 %v4852_v2, %v6599_v52  ;;  %v2798_v32 = vpop.f32.mrf.mxu0 }
 0x1ce   : > { %v2502_v58 = vpop.f32.mrf.mxu1 }
 0x1cf   : > { %v6707_v39 = vadd.f32 %v4908_v30, %v2554_v18  ;;  %v2553_v49 = vadd.f32 %v2502_v58, %v6602_v54  ;;  %v4911_v35 = vpop.f32.mrf.mxu0 }
 0x1d0   : > { %v4855_v22 = vpop.f32.mrf.mxu1 }
 0x1d1   : > { %v6710_v59 = vadd.f32 %v2798_v32, %v2553_v49  ;;  %v2556_v16 = vadd.f32 %v4855_v22, %v6605_v21  ;;  %v2808_v23 = vpop.f32.mrf.mxu0 }
 0x1d2   : > { %v2512_v19 = vpop.f32.mrf.mxu1 }
 0x1d3   : > { %v6714_v12 = vadd.f32 %v4911_v35, %v2556_v16  ;;  %v2555_v61 = vadd.f32 %v2512_v19, %v6608_v6  ;;  %v4972_v52 = vpop.f32.mrf.mxu0 }
 0x1d4   : > { %v4916_v4 = vpop.f32.mrf.mxu1 }
 0x1d5   : > { %v6717_v27 = vadd.f32 %v2808_v23, %v2555_v61  ;;  %v3250_v42 = vadd.f32 %v4916_v4, %v6611_v62  ;;  %v3502_v54 = vpop.f32.mrf.mxu0 }
 0x1d6   : > { %v3070_v21 = vpop.f32.mrf.mxu1 }
 0x1d7   : > { %v3682_v63 = vadd.f32 %v4972_v52, %v3250_v42  ;;  %v3249_v6 = vadd.f32 %v3070_v21, %v6614_v10  ;;  %v4975_v37 = vpop.f32.mrf.mxu0 }
 0x1d8   : > { %v4919_v51 = vpop.f32.mrf.mxu1 }
 0x1d9   : > { %3719 = vst.msk [vmem:[%s6723_s14 + $0x8] sm:$0xff] %vm3717_vm7, %v3682_v63  ;;  %v3681_v62 = vadd.f32 %v3502_v54, %v3249_v6  ;;  %v3252_v46 = vadd.f32 %v4919_v51, %v6617_v53  ;;  %v3512_v9 = vpop.f32.mrf.mxu0 }
 0x1da   : > { %v3080_v20 = vpop.f32.mrf.mxu1 }
 0x1db   : > { %3718 = vst.msk [vmem:[%s6723_s14] sm:$0xff] %vm3717_vm7, %v3681_v62  ;;  %v3684_v24 = vadd.f32 %v4975_v37, %v3252_v46  ;;  %v3251_v43 = vadd.f32 %v3080_v20, %v6620_v0  ;;  %v4978_v8 = vpop.f32.mrf.mxu0 }
 0x1dc   : > { %v4922_v55 = vpop.f32.mrf.mxu1 }
 0x1dd   : > { %3721 = vst.msk [vmem:[%s6723_s14 + $0x18] sm:$0xff] %vm3717_vm7, %v3684_v24  ;;  %v3683_v10 = vadd.f32 %v3512_v9, %v3251_v43  ;;  %v3254_v30 = vadd.f32 %v4922_v55, %v6623_v3  ;;  %v3522_v2 = vpop.f32.mrf.mxu0 }
 0x1de   : > { %v3090_v18 = vpop.f32.mrf.mxu1 }
 0x1df   : > { %3720 = vst.msk [vmem:[%s6723_s14 + $0x10] sm:$0xff] %vm3717_vm7, %v3683_v10  ;;  %v3686_v53 = vadd.f32 %v4978_v8, %v3254_v30  ;;  %v3253_v32 = vadd.f32 %v3090_v18, %v6626_v50  ;;  %v4981_v58 = vpop.f32.mrf.mxu0 }
 0x1e0   : > { %v4925_v49 = vpop.f32.mrf.mxu1 }
 0x1e1   : > { %3723 = vst.msk [vmem:[%s6723_s14 + $0x28] sm:$0xff] %vm3717_vm7, %v3686_v53  ;;  %v3685_v0 = vadd.f32 %v3522_v2, %v3253_v32  ;;  %v3256_v35 = vadd.f32 %v4925_v49, %v6629_v26  ;;  %v3532_v22 = vpop.f32.mrf.mxu0 }
 0x1e2   : > { %v3100_v16 = vpop.f32.mrf.mxu1 }
 0x1e3   : > { %3722 = vst.msk [vmem:[%s6723_s14 + $0x20] sm:$0xff] %vm3717_vm7, %v3685_v0  ;;  %v3688_v3 = vadd.f32 %v4981_v58, %v3256_v35  ;;  %v3255_v23 = vadd.f32 %v3100_v16, %v6632_v40  ;;  %v4984_v19 = vpop.f32.mrf.mxu0 }
 0x1e4   : > { %v4928_v61 = vpop.f32.mrf.mxu1 }
 0x1e5   : > { %3725 = vst.msk [vmem:[%s6723_s14 + $0x38] sm:$0xff] %vm3717_vm7, %v3688_v3  ;;  %v3687_v50 = vadd.f32 %v3532_v22, %v3255_v23  ;;  %v3258_v52 = vadd.f32 %v4928_v61, %v6635_v15  ;;  %v3542_v4 = vpop.f32.mrf.mxu0 }
 0x1e6   : > { %v3110_v42 = vpop.f32.mrf.mxu1 }
 0x1e7   : > { %3724 = vst.msk [vmem:[%s6723_s14 + $0x30] sm:$0xff] %vm3717_vm7, %v3687_v50  ;;  %v3690_v26 = vadd.f32 %v4984_v19, %v3258_v52  ;;  %v3257_v54 = vadd.f32 %v3110_v42, %v6638_v47  ;;  %v4987_v21 = vpop.f32.mrf.mxu0 }
 0x1e8   : > { %v4931_v63 = vpop.f32.mrf.mxu1 }
 0x1e9   : > { %3727 = vst.msk [vmem:[%s6723_s14 + $0x48] sm:$0xff] %vm3717_vm7, %v3690_v26  ;;  %v3689_v40 = vadd.f32 %v3542_v4, %v3257_v54  ;;  %v3260_v6 = vadd.f32 %v4931_v63, %v6641_v41  ;;  %v3552_v37 = vpop.f32.mrf.mxu0 }
 0x1ea   : > { %v3120_v51 = vpop.f32.mrf.mxu1 }
 0x1eb   : > { %3726 = vst.msk [vmem:[%s6723_s14 + $0x40] sm:$0xff] %vm3717_vm7, %v3689_v40  ;;  %v3692_v15 = vadd.f32 %v4987_v21, %v3260_v6  ;;  %v3259_v62 = vadd.f32 %v3120_v51, %v6644_v14  ;;  %v4990_v46 = vpop.f32.mrf.mxu0 }
 0x1ec   : > { %v4934_v9 = vpop.f32.mrf.mxu1 }
 0x1ed   : > { %3729 = vst.msk [vmem:[%s6723_s14 + $0x58] sm:$0xff] %vm3717_vm7, %v3692_v15  ;;  %v3691_v47 = vadd.f32 %v3552_v37, %v3259_v62  ;;  %v3262_v20 = vadd.f32 %v4934_v9, %v6647_v33  ;;  %v3562_v24 = vpop.f32.mrf.mxu0 }
 0x1ee   : > { %v3130_v43 = vpop.f32.mrf.mxu1 }
 0x1ef   : > { %3728 = vst.msk [vmem:[%s6723_s14 + $0x50] sm:$0xff] %vm3717_vm7, %v3691_v47  ;;  %v3694_v41 = vadd.f32 %v4990_v46, %v3262_v20  ;;  %v3261_v8 = vadd.f32 %v3130_v43, %v6650_v31  ;;  %v4993_v55 = vpop.f32.mrf.mxu0 }
 0x1f0   : > { %v4937_v10 = vpop.f32.mrf.mxu1 }
 0x1f1   : > { %3731 = vst.msk [vmem:[%s6723_s14 + $0x68] sm:$0xff] %vm3717_vm7, %v3694_v41  ;;  %v3693_v14 = vadd.f32 %v3562_v24, %v3261_v8  ;;  %v3264_v30 = vadd.f32 %v4937_v10, %v6653_v25  ;;  %v3572_v2 = vpop.f32.mrf.mxu0 }
 0x1f2   : > { %v3140_v18 = vpop.f32.mrf.mxu1 }
 0x1f3   : > { %3730 = vst.msk [vmem:[%s6723_s14 + $0x60] sm:$0xff] %vm3717_vm7, %v3693_v14  ;;  %v3696_v33 = vadd.f32 %v4993_v55, %v3264_v30  ;;  %v3263_v53 = vadd.f32 %v3140_v18, %v6656_v5  ;;  %v4996_v32 = vpop.f32.mrf.mxu0 }
 0x1f4   : > { %v4940_v58 = vpop.f32.mrf.mxu1 }
 0x1f5   : > { %3733 = vst.msk [vmem:[%s6723_s14 + $0x78] sm:$0xff] %vm3717_vm7, %v3696_v33  ;;  %v3695_v31 = vadd.f32 %v3572_v2, %v3263_v53  ;;  %v3266_v49 = vadd.f32 %v4940_v58, %v6659_v44  ;;  %v3582_v0 = vpop.f32.mrf.mxu0 }
 0x1f6   : > { %v3150_v35 = vpop.f32.mrf.mxu1 }
 0x1f7   : > { %3732 = vst.msk [vmem:[%s6723_s14 + $0x70] sm:$0xff] %vm3717_vm7, %v3695_v31  ;;  %v3698_v25 = vadd.f32 %v4996_v32, %v3266_v49  ;;  %v3265_v22 = vadd.f32 %v3150_v35, %v6662_v38  ;;  %v4999_v16 = vpop.f32.mrf.mxu0 }
 0x1f8   : > { %v4943_v3 = vpop.f32.mrf.mxu1 }
 0x1f9   : > { %3735 = vst.msk [vmem:[%s6723_s14 + $0x88] sm:$0xff] %vm3717_vm7, %v3698_v25  ;;  %v3697_v5 = vadd.f32 %v3582_v0, %v3265_v22  ;;  %v3268_v23 = vadd.f32 %v4943_v3, %v6665_v56  ;;  %v3592_v19 = vpop.f32.mrf.mxu0 }
 0x1fa   : > { %v3160_v61 = vpop.f32.mrf.mxu1 }
 0x1fb   : > { %3734 = vst.msk [vmem:[%s6723_s14 + $0x80] sm:$0xff] %vm3717_vm7, %v3697_v5  ;;  %v3700_v44 = vadd.f32 %v4999_v16, %v3268_v23  ;;  %v3267_v50 = vadd.f32 %v3160_v61, %v6668_v34  ;;  %v5002_v52 = vpop.f32.mrf.mxu0 }
 0x1fc   : > { %v4946_v4 = vpop.f32.mrf.mxu1 }
 0x1fd   : > { %3737 = vst.msk [vmem:[%s6723_s14 + $0x98] sm:$0xff] %vm3717_vm7, %v3700_v44  ;;  %v3699_v38 = vadd.f32 %v3592_v19, %v3267_v50  ;;  %v3270_v42 = vadd.f32 %v4946_v4, %v6671_v28  ;;  %v3602_v26 = vpop.f32.mrf.mxu0 }
 0x1fe   : > { %v3170_v54 = vpop.f32.mrf.mxu1 }
 0x1ff   : > { %3736 = vst.msk [vmem:[%s6723_s14 + $0x90] sm:$0xff] %vm3717_vm7, %v3699_v38  ;;  %v3702_v56 = vadd.f32 %v5002_v52, %v3270_v42  ;;  %v3269_v21 = vadd.f32 %v3170_v54, %v6674_v7  ;;  %v5005_v63 = vpop.f32.mrf.mxu0 }
 0x200   : > { %v4949_v40 = vpop.f32.mrf.mxu1 }
 0x201   : > { %3739 = vst.msk [vmem:[%s6723_s14 + $0xa8] sm:$0xff] %vm3717_vm7, %v3702_v56  ;;  %v3701_v34 = vadd.f32 %v3602_v26, %v3269_v21  ;;  %v3272_v6 = vadd.f32 %v4949_v40, %v6677_v17  ;;  %v3612_v37 = vpop.f32.mrf.mxu0 }
 0x202   : > { %v3180_v51 = vpop.f32.mrf.mxu1 }
 0x203   : > { %3738 = vst.msk [vmem:[%s6723_s14 + $0xa0] sm:$0xff] %vm3717_vm7, %v3701_v34  ;;  %v3704_v28 = vadd.f32 %v5005_v63, %v3272_v6  ;;  %v3271_v15 = vadd.f32 %v3180_v51, %v6680_v13  ;;  %v5008_v62 = vpop.f32.mrf.mxu0 }
 0x204   : > { %v4952_v46 = vpop.f32.mrf.mxu1 }
 0x205   : > { %3741 = vst.msk [vmem:[%s6723_s14 + $0xb8] sm:$0xff] %vm3717_vm7, %v3704_v28  ;;  %v3703_v7 = vadd.f32 %v3612_v37, %v3271_v15  ;;  %v3274_v9 = vadd.f32 %v4952_v46, %v6683_v36  ;;  %v3622_v47 = vpop.f32.mrf.mxu0 }
 0x206   : > { %v3190_v20 = vpop.f32.mrf.mxu1 }
 0x207   : > { %3740 = vst.msk [vmem:[%s6723_s14 + $0xb0] sm:$0xff] %vm3717_vm7, %v3703_v7  ;;  %v3706_v17 = vadd.f32 %v5008_v62, %v3274_v9  ;;  %v3273_v24 = vadd.f32 %v3190_v20, %v6686_v60  ;;  %v5011_v43 = vpop.f32.mrf.mxu0 }
 0x208   : > { %v4955_v41 = vpop.f32.mrf.mxu1 }
 0x209   : > { %3743 = vst.msk [vmem:[%s6723_s14 + $0xc8] sm:$0xff] %vm3717_vm7, %v3706_v17  ;;  %v3705_v13 = vadd.f32 %v3622_v47, %v3273_v24  ;;  %v3276_v8 = vadd.f32 %v4955_v41, %v6689_v29  ;;  %v3632_v55 = vpop.f32.mrf.mxu0 }
 0x20a   : > { %v3200_v10 = vpop.f32.mrf.mxu1 }
 0x20b   : > { %3742 = vst.msk [vmem:[%s6723_s14 + $0xc0] sm:$0xff] %vm3717_vm7, %v3705_v13  ;;  %v3708_v36 = vadd.f32 %v5011_v43, %v3276_v8  ;;  %v3275_v14 = vadd.f32 %v3200_v10, %v6692_v57  ;;  %v5014_v30 = vpop.f32.mrf.mxu0 }
 0x20c   : > { %v4958_v2 = vpop.f32.mrf.mxu1 }
 0x20d   : > { %3745 = vst.msk [vmem:[%s6723_s14 + $0xd8] sm:$0xff] %vm3717_vm7, %v3708_v36  ;;  %v3707_v60 = vadd.f32 %v3632_v55, %v3275_v14  ;;  %v3278_v18 = vadd.f32 %v4958_v2, %v6695_v1  ;;  %v3642_v33 = vpop.f32.mrf.mxu0 }
 0x20e   : > { %v3210_v53 = vpop.f32.mrf.mxu1 }
 0x20f   : > { %3744 = vst.msk [vmem:[%s6723_s14 + $0xd0] sm:$0xff] %vm3717_vm7, %v3707_v60  ;;  %v3710_v29 = vadd.f32 %v5014_v30, %v3278_v18  ;;  %v3277_v32 = vadd.f32 %v3210_v53, %v6698_v45  ;;  %v5017_v58 = vpop.f32.mrf.mxu0 }
 0x210   : > { %v4961_v31 = vpop.f32.mrf.mxu1 }
 0x211   : > { %3747 = vst.msk [vmem:[%s6723_s14 + $0xe8] sm:$0xff] %vm3717_vm7, %v3710_v29  ;;  %v3709_v57 = vadd.f32 %v3642_v33, %v3277_v32  ;;  %v3280_v49 = vadd.f32 %v4961_v31, %v6701_v11  ;;  %v3652_v0 = vpop.f32.mrf.mxu0 }
 0x212   : > { %v3220_v35 = vpop.f32.mrf.mxu1 }
 0x213   : > { %3746 = vst.msk [vmem:[%s6723_s14 + $0xe0] sm:$0xff] %vm3717_vm7, %v3709_v57  ;;  %v3712_v1 = vadd.f32 %v5017_v58, %v3280_v49  ;;  %v3279_v25 = vadd.f32 %v3220_v35, %v6704_v48  ;;  %v5020_v22 = vpop.f32.mrf.mxu0 }
 0x214   : > { %v4964_v16 = vpop.f32.mrf.mxu1 }
 0x215   : > { %3749 = vst.msk [vmem:[%s6723_s14 + $0xf8] sm:$0xff] %vm3717_vm7, %v3712_v1  ;;  %v3711_v45 = vadd.f32 %v3652_v0, %v3279_v25  ;;  %v3282_v3 = vadd.f32 %v4964_v16, %v6707_v39  ;;  %v3662_v5 = vpop.f32.mrf.mxu0 }
 0x216   : > { %v3230_v23 = vpop.f32.mrf.mxu1 }
 0x217   : > { %3748 = vst.msk [vmem:[%s6723_s14 + $0xf0] sm:$0xff] %vm3717_vm7, %v3711_v45  ;;  %v3714_v11 = vadd.f32 %v5020_v22, %v3282_v3  ;;  %v3281_v19 = vadd.f32 %v3230_v23, %v6710_v59  ;;  %v5023_v44 = vpop.f32.mrf.mxu0 }
 0x218   : > { %v4967_v61 = vpop.f32.mrf.mxu1 }
 0x219   : > { %3751 = vst.msk [vmem:[%s6723_s14 + $0x108] sm:$0xff] %vm3717_vm7, %v3714_v11  ;;  %v3713_v48 = vadd.f32 %v3662_v5, %v3281_v19  ;;  %v3284_v50 = vadd.f32 %v4967_v61, %v6714_v12  ;;  %v3672_v38 = vpop.f32.mrf.mxu0 }
 0x21a   : > { %v3240_v52 = vpop.f32.mrf.mxu1 }
 0x21b   : > { %3750 = vst.msk [vmem:[%s6723_s14 + $0x100] sm:$0xff] %vm3717_vm7, %v3713_v48  ;;  %v3716_v39 = vadd.f32 %v5023_v44, %v3284_v50  ;;  %v3283_v4 = vadd.f32 %v3240_v52, %v6717_v27 }
 0x21d   : > { %3753 = vst.msk [vmem:[%s6723_s14 + $0x118] sm:$0xff] %vm3717_vm7, %v3716_v39  ;;  %v3715_v42 = vadd.f32 %v3672_v38, %v3283_v4 }
 0x21f   : > { %3752 = vst.msk [vmem:[%s6723_s14 + $0x110] sm:$0xff] %vm3717_vm7, %v3715_v42 }
 0x220 PF: > { %s12_s11 = sadd.s32 1, %s5109_s11   ;;  %s6925_s9 = smov %s5105_s10 }
 0x221   : > { %p9_p5 = scmp.ge.s32.totalorder %s12_s11, 4   ;;  %s6926_s10 = smov %s6928_s12 }
 0x223   :  { %11 = sbr.rel (!%p9_p5) target bundleno = 2 (0x2), region = 67 }

</bundles_post_ra>
